<compile_context>
chip_gen: v7x
topology: tpu7x:2x2x1
jax: 0.10.0
libtpu: 0.0.40
codegen_flags: <defaults>
</compile_context>

<pallas_src>
import functools

import jax
import jax.numpy as jnp
from jax import lax
from jax.experimental import pallas as pl
from jax.experimental.pallas import tpu as pltpu

VMEM_LIMIT = 32 * 1024 * 1024


def _round_up(x, n):
    return ((x + n - 1) // n) * n


# ----------------------------------------------------------------------------
# Kernel 1: query path (pixels-on-lanes).
#   emb = W_emb^T @ x -> (dim, t_hw), bg = W_bg^T @ x -> (1, t_hw)
#   q is channel-L2-normalized and stored as (B, dim, HW_pad) bf16; the
#   balanced-BCE partial sums are accumulated over the pixel-tile axis into one
#   (8, 128) block per image (combined in the wrapper).
# ----------------------------------------------------------------------------
def q_path_kernel(x_ref, we_ref, be_ref, wb_ref, bb_ref, sal_ref,
                  q_ref, part_ref, *, hw):
    j = pl.program_id(1)
    t_hw = x_ref.shape[1]

    @pl.when(j == 0)
    def _():
        part_ref[...] = jnp.zeros_like(part_ref)

    x = x_ref[...]                                                    # (Cin, t_hw) bf16
    emb = jnp.dot(we_ref[...], x, preferred_element_type=jnp.float32) + be_ref[...]
    bg = jnp.dot(wb_ref[...], x, preferred_element_type=jnp.float32) + bb_ref[...]

    # F.normalize over channels, eps = 1e-12: sublane reduce + lane-dense rsqrt
    ssq = jnp.sum(emb * emb, axis=0, keepdims=True)                   # (1, t_hw)
    q_ref[...] = (emb * lax.rsqrt(jnp.maximum(ssq, 1e-24))).astype(q_ref.dtype)

    # balanced BCE partial sums, all on lane-dense (1, t_hw) rows; pad pixels masked
    col = lax.broadcasted_iota(jnp.int32, (1, t_hw), 1) + j * t_hw
    valid = (col < hw).astype(jnp.float32)
    labels = (sal_ref[...].astype(jnp.float32) >= 0.5).astype(jnp.float32)
    gt0 = (bg >= 0.0).astype(jnp.float32)
    loss_val = bg * (labels - gt0) - jnp.log(1.0 + jnp.exp(bg - 2.0 * bg * gt0))
    lpos = jnp.sum(-labels * loss_val * valid, keepdims=True)         # (1, 1)
    lneg = jnp.sum(-(1.0 - labels) * loss_val * valid, keepdims=True)
    npos = jnp.sum(labels * valid, keepdims=True)
    nneg = jnp.sum((1.0 - labels) * valid, keepdims=True)

    lane = lax.broadcasted_iota(jnp.int32, (8, 128), 1)
    sub = lax.broadcasted_iota(jnp.int32, (8, 128), 0)
    row0 = sub == 0
    blk = jnp.where(row0 & (lane == 0), lpos, 0.0)
    blk = jnp.where(row0 & (lane == 1), lneg, blk)
    blk = jnp.where(row0 & (lane == 2), npos, blk)
    blk = jnp.where(row0 & (lane == 3), nneg, blk)
    part_ref[...] += blk


def q_path(x, w_emb_t, b_emb_t, w_bg_t, b_bg, sal, *, hw, dim, t_hw):
    B, Cin, HW_pad = x.shape
    G = HW_pad // t_hw
    kernel = functools.partial(q_path_kernel, hw=hw)
    return pl.pallas_call(
        kernel,
        grid=(B, G),
        in_specs=[pl.BlockSpec((None, Cin, t_hw), lambda b, j: (b, 0, j)),
                  pl.BlockSpec((dim, Cin), lambda b, j: (0, 0)),
                  pl.BlockSpec((dim, 1), lambda b, j: (0, 0)),
                  pl.BlockSpec((1, Cin), lambda b, j: (0, 0)),
                  pl.BlockSpec((1, 1), lambda b, j: (0, 0)),
                  pl.BlockSpec((None, 1, t_hw), lambda b, j: (b, 0, j))],
        out_specs=[pl.BlockSpec((None, dim, t_hw), lambda b, j: (b, 0, j)),
                   pl.BlockSpec((None, 8, 128), lambda b, j: (b, 0, 0))],
        out_shape=(jax.ShapeDtypeStruct((B, dim, HW_pad), jnp.bfloat16),
                   jax.ShapeDtypeStruct((B, 8, 128), jnp.float32)),
        compiler_params=pltpu.CompilerParams(
            dimension_semantics=("parallel", "arbitrary"),
            vmem_limit_bytes=VMEM_LIMIT),
    )(x, w_emb_t, b_emb_t, w_bg_t, b_bg, sal)


# ----------------------------------------------------------------------------
# Kernel 2: key path -> per-image foreground prototypes (pixels-on-lanes).
#   k = W_k^T @ x -> (dim, t_hw), normalized with a sublane reduce + lane-dense
#   rsqrt; the saliency-weighted segment sum is one tiny MXU contraction per
#   tile, accumulated into a (1, dim) per-image output.
# ----------------------------------------------------------------------------
def k_proto_kernel(x_ref, w_ref, b_ref, sal_ref, proto_ref):
    @pl.when(pl.program_id(1) == 0)
    def _():
        proto_ref[...] = jnp.zeros_like(proto_ref)

    k = jnp.dot(w_ref[...], x_ref[...], preferred_element_type=jnp.float32) + b_ref[...]
    ssq = jnp.sum(k * k, axis=0, keepdims=True)                       # (1, t_hw)
    k = k * lax.rsqrt(jnp.maximum(ssq, 1e-24))                        # (dim, t_hw)
    sal = sal_ref[...].astype(jnp.float32)                            # (1, t_hw); pad pixels = 0
    contrib = lax.dot_general(sal, k, (((1,), (1,)), ((), ())),
                              preferred_element_type=jnp.float32)     # (1, dim)
    proto_ref[...] += contrib


def k_path(x, w_t, b_t, sal, *, dim, t_hw):
    B, Cin, HW_pad = x.shape
    G = HW_pad // t_hw
    # TODO(synk): on v7x (2 TCs) split the pixel axis into an outer "parallel" and
    # inner "arbitrary" axis with per-core partial prototype sums when B is small.
    return pl.pallas_call(
        k_proto_kernel,
        grid=(B, G),
        in_specs=[pl.BlockSpec((None, Cin, t_hw), lambda b, j: (b, 0, j)),
                  pl.BlockSpec((dim, Cin), lambda b, j: (0, 0)),
                  pl.BlockSpec((dim, 1), lambda b, j: (0, 0)),
                  pl.BlockSpec((None, 1, t_hw), lambda b, j: (b, 0, j))],
        out_specs=pl.BlockSpec((None, 1, dim), lambda b, j: (b, 0, 0)),
        out_shape=jax.ShapeDtypeStruct((B, 1, dim), jnp.float32),
        compiler_params=pltpu.CompilerParams(
            dimension_semantics=("parallel", "arbitrary"),
            vmem_limit_bytes=VMEM_LIMIT),
    )(x, w_t, b_t, sal)


# ----------------------------------------------------------------------------
# Kernel 3: logits = [q @ prototypes, q @ queue] / T
#   queue and prototypes stay in their native (dim, K) / (dim, B_pad) fp32
#   layouts (lane-dense blocks, canonical (m,k)x(k,n) dots); each block is cast
#   to bf16 for the MXU in-kernel so the HBM buffer never loses precision.
# ----------------------------------------------------------------------------
def logits_kernel(q_ref, p_ref, neg_ref, lb_ref, lm_ref, *, inv_t):
    q = q_ref[...]                                                    # (tm, dim) bf16

    @pl.when(pl.program_id(1) == 0)
    def _():
        lb_ref[...] = jnp.dot(q, p_ref[...].astype(jnp.bfloat16),
                              preferred_element_type=jnp.float32) * inv_t

    # TODO(synk): emit lm in bf16 / fuse the downstream cross-entropy to halve
    # the dominant HBM writeback once the consumer tolerates it.
    lm_ref[...] = jnp.dot(q, neg_ref[...].astype(jnp.bfloat16),
                          preferred_element_type=jnp.float32) * inv_t


def compute_logits(q, proto_t, queue, *, inv_t, tm, tc):
    Mp, dim = q.shape
    B_pad = proto_t.shape[1]
    Kp = queue.shape[1]
    return pl.pallas_call(
        functools.partial(logits_kernel, inv_t=inv_t),
        grid=(Mp // tm, Kp // tc),
        in_specs=[pl.BlockSpec((tm, dim), lambda i, j: (i, 0)),
                  pl.BlockSpec((dim, B_pad), lambda i, j: (0, 0)),
                  pl.BlockSpec((dim, tc), lambda i, j: (0, j))],
        out_specs=[pl.BlockSpec((tm, B_pad), lambda i, j: (i, 0)),
                   pl.BlockSpec((tm, tc), lambda i, j: (i, j))],
        out_shape=(jax.ShapeDtypeStruct((Mp, B_pad), jnp.float32),
                   jax.ShapeDtypeStruct((Mp, Kp), jnp.float32)),
        compiler_params=pltpu.CompilerParams(
            dimension_semantics=("parallel", "arbitrary"),
            vmem_limit_bytes=VMEM_LIMIT),
    )(q, proto_t, queue)


# ----------------------------------------------------------------------------
# Full forward (jittable glue + kernels)
# ----------------------------------------------------------------------------
def contrastive_forward(im_q, im_k, sal_q, sal_k, params_q, params_k,
                        queue, queue_ptr, *, m, T, K, dim):
    B, Cin, H, W = im_q.shape
    HW = H * W
    assert dim <= 128
    assert K % B == 0                   # same assert as PyTorch _dequeue_and_enqueue

    t_hw = min(4096, _round_up(HW, 128))
    HW_pad = _round_up(HW, t_hw)
    pad = HW_pad - HW

    def prep_img(im):
        x = im.reshape(B, Cin, HW).astype(jnp.bfloat16)
        return jnp.pad(x, ((0, 0), (0, 0), (0, pad))) if pad else x

    def prep_sal(s):
        s = s.reshape(B, 1, HW).astype(jnp.bfloat16)
        return jnp.pad(s, ((0, 0), (0, 0), (0, pad))) if pad else s

    xq, xk = prep_img(im_q), prep_img(im_k)
    sq, sk = prep_sal(sal_q), prep_sal(sal_k)

    # momentum update of the key encoder (tiny elementwise glue, stays fp32)
    params_k = tuple(pk * m + pq * (1.0 - m) for pk, pq in zip(params_k, params_q))

    # TODO(synk): concat_all_gather / _batch_shuffle_ddp / _batch_unshuffle_ddp are
    # identity at world_size=1 (and there is no BatchNorm here), so they are omitted.

    # ---- query path (Pallas): q embedding + balanced-BCE partial sums ----
    wq, bq, wbg, bbg = params_q
    q_all, parts = q_path(
        xq,
        wq.T.astype(jnp.bfloat16), bq.T.astype(jnp.float32),
        wbg.T.astype(jnp.bfloat16), bbg.astype(jnp.float32),
        sq, hw=HW, dim=dim, t_hw=t_hw)

    sums = jnp.sum(parts[:, 0, :4], axis=0)
    lpos, lneg, npos, nneg = sums[0], sums[1], sums[2], sums[3]
    w_bal = nneg / (npos + nneg)
    sal_loss = (w_bal * lpos + (1.0 - w_bal) * lneg) / float(B * HW)

    # ---- key path (Pallas): per-image foreground prototypes ----
    wk, bk = params_k[0], params_k[1]
    proto_sums = k_path(xk, wk.T.astype(jnp.bfloat16), bk.T.astype(jnp.float32),
                        sk, dim=dim, t_hw=t_hw)[:, 0, :]              # (B, dim)
    pn = jnp.sqrt(jnp.sum(proto_sums * proto_sums, axis=-1, keepdims=True))
    prototypes = proto_sums / jnp.maximum(pn, 1e-12)                   # (B, dim) f32

    # ---- sal_q targets: static-size nonzero (no host sync inside the step) ----
    offset = jnp.arange(0, 2 * B, 2, dtype=jnp.float32).reshape(B, 1)
    sq_f32 = sal_q.reshape(B, HW).astype(jnp.float32)
    if pad:
        sq_f32 = jnp.pad(sq_f32, ((0, 0), (0, pad)))
    tagged = ((sq_f32 + offset) * sq_f32).reshape(-1)                  # (B*HW_pad,)
    M_upper = B * HW
    idx = jnp.nonzero(tagged, size=M_upper, fill_value=0)[0]           # (M_upper,)
    n_valid = jnp.sum((tagged != 0.0).astype(jnp.int32))
    sal_q_targets = jnp.floor(tagged[idx] * 0.5)                       # (M_upper,) float

    # ---- gather foreground q embeddings from the (B, dim, HW_pad) layout ----
    b_idx = idx // HW_pad
    p_idx = idx % HW_pad
    q_sel = q_all[b_idx, :, p_idx]                                     # (M_upper, dim) bf16

    tm = 512
    Mp = _round_up(max(M_upper, tm), tm)
    q_sel = jnp.pad(q_sel, ((0, Mp - M_upper), (0, 0)))

    B_pad = max(128, _round_up(B, 128))
    proto_t = jnp.zeros((dim, B_pad), jnp.float32).at[:, :B].set(prototypes.T)
    Kp = _round_up(K, 128)
    queue_in = queue if Kp == K else jnp.pad(queue, ((0, 0), (0, Kp - K)))
    if Kp <= 2048:
        tc = Kp                               # whole queue resident, DMA'd once
    else:
        tc = max(c for c in (2048, 1024, 512, 256, 128) if Kp % c == 0)

    lb, lm = compute_logits(q_sel, proto_t, queue_in, inv_t=1.0 / T, tm=tm, tc=tc)
    logits = jnp.concatenate([lb[:M_upper, :B], lm[:M_upper, :K]], axis=1)

    # ---- dequeue & enqueue: queue kept fp32 in its native (dim, K) layout ----
    zero = jnp.zeros((), dtype=queue_ptr.dtype)
    queue = lax.dynamic_update_slice(queue, prototypes.T.astype(queue.dtype),
                                     (zero, queue_ptr))
    queue_ptr = (queue_ptr + B) % K

    return logits, sal_q_targets, n_valid, sal_loss, params_k, queue, queue_ptr


if __name__ == "__main__":
    B, Cin, H, W = 2, 3, 16, 16
    dim, K, m, T = 32, 128, 0.999, 0.07

    key = jax.random.PRNGKey(0)
    k1, k2, k3, k4, k5, k6, k7 = jax.random.split(key, 7)

    im_q = jax.random.normal(k1, (B, Cin, H, W), jnp.float32)          # NCHW, like PyTorch
    im_k = jax.random.normal(k2, (B, Cin, H, W), jnp.float32)
    sal_q = (jax.random.uniform(k3, (B, H, W)) > 0.5).astype(jnp.float32)
    sal_k = (jax.random.uniform(k4, (B, H, W)) > 0.5).astype(jnp.float32)

    # deterministic synthetic backbone params (1x1 conv embedding + saliency head)
    wq = 0.1 * jax.random.normal(k5, (Cin, dim), jnp.float32)
    bq = jnp.zeros((1, dim), jnp.float32)
    wbg = 0.1 * jax.random.normal(k6, (Cin, 1), jnp.float32)
    bbg = jnp.zeros((1, 1), jnp.float32)
    params_q = (wq, bq, wbg, bbg)
    params_k = tuple(jnp.array(p) for p in params_q)                   # key = copy of query

    # queue buffer: randn(dim, K) normalized along dim=0, kept fp32 / (dim, K)
    queue = jax.random.normal(k7, (dim, K), jnp.float32)
    queue = queue / jnp.maximum(jnp.linalg.norm(queue, axis=0, keepdims=True), 1e-12)
    queue_ptr = jnp.zeros((), jnp.int32)

    fwd = jax.jit(functools.partial(contrastive_forward, m=m, T=T, K=K, dim=dim))
    out = fwd(im_q, im_k, sal_q, sal_k, params_q, params_k, queue, queue_ptr)
    jax.block_until_ready(out)
    logits_pad, targets_pad, n_valid, sal_loss, params_k, queue, queue_ptr = out

    n = int(n_valid)                 # single host read of the dynamic foreground count
    logits = logits_pad[:n]
    sal_q_targets = targets_pad[:n]
    assert logits.shape == (n, B + K)
    assert sal_q_targets.shape == (n,)
    assert bool(jnp.isfinite(sal_loss))
    assert bool(jnp.all(jnp.isfinite(logits)))
    print("KERNEL_OK")
</pallas_src>

<mosaic_0001>
module attributes {stable_mosaic.version = 11 : i64} {
  func.func private @main(%arg0: i32) attributes {dimension_semantics = [#tpu.dimension_semantics<core_parallel>], iteration_bounds = array<i64: 2>, tpu.core_type = #tpu.core_type<sc_scalar_subcore>, window_params = []} {
    return
  }
}

module attributes {stable_mosaic.version = 11 : i64} {
  func.func private @main(%arg0: i32) attributes {dimension_semantics = [#tpu.dimension_semantics<core_parallel>], iteration_bounds = array<i64: 2>, tpu.core_type = #tpu.core_type<sc_scalar_subcore>, window_params = []} {
    return
  }
}

module attributes {stable_mosaic.version = 11 : i64} {
  func.func @q_path_kernel(%arg0: i32, %arg1: i32, %arg2: memref<1x3x256xbf16, #tpu.memory_space<vmem>>, %arg3: memref<32x3xbf16, #tpu.memory_space<vmem>>, %arg4: memref<32x1xf32, #tpu.memory_space<vmem>>, %arg5: memref<1x3xbf16, #tpu.memory_space<vmem>>, %arg6: memref<1x1xf32, #tpu.memory_space<vmem>>, %arg7: memref<1x1x256xbf16, #tpu.memory_space<vmem>>, %arg8: memref<1x32x256xbf16, #tpu.memory_space<vmem>>, %arg9: memref<1x8x128xf32, #tpu.memory_space<vmem>>) attributes {dimension_semantics = [#tpu.dimension_semantics<parallel>, #tpu.dimension_semantics<arbitrary>], iteration_bounds = array<i64: 2, 1>, scalar_prefetch = 0 : i64, scratch_operands = 0 : i64, tpu.core_type = #tpu.core_type<tc>, window_params = [{transform_indices = @transform_0, window_bounds = array<i64: 1, 3, 256>}, {pipeline_mode = #tpu.pipeline_mode<synchronous>, transform_indices = @transform_1, window_bounds = array<i64: 32, 3>}, {pipeline_mode = #tpu.pipeline_mode<synchronous>, transform_indices = @transform_2, window_bounds = array<i64: 32, 1>}, {pipeline_mode = #tpu.pipeline_mode<synchronous>, transform_indices = @transform_3, window_bounds = array<i64: 1, 3>}, {pipeline_mode = #tpu.pipeline_mode<synchronous>, transform_indices = @transform_4, window_bounds = array<i64: 1, 1>}, {transform_indices = @transform_5, window_bounds = array<i64: 1, 1, 256>}, {transform_indices = @transform_6, window_bounds = array<i64: 1, 32, 256>}, {transform_indices = @transform_7, window_bounds = array<i64: 1, 8, 128>}]} {
    %c0_i32 = arith.constant 0 : i32
    %0 = arith.cmpi eq, %arg1, %c0_i32 : i32
    %1 = arith.extui %0 : i1 to i32
    %c0_i32_0 = arith.constant 0 : i32
    %2 = arith.cmpi ne, %1, %c0_i32_0 : i32
    scf.if %2 {
      %cst_42 = arith.constant 0.000000e+00 : f32
      %126 = vector.broadcast %cst_42 : f32 to vector<8x128xf32>
      %c0_43 = arith.constant 0 : index
      %c0_44 = arith.constant 0 : index
      %c0_45 = arith.constant 0 : index
      %127 = vector.load %arg9[%c0_43, %c0_44, %c0_45] : memref<1x8x128xf32, #tpu.memory_space<vmem>>, vector<1x8x128xf32>
      %128 = vector.shape_cast %127 : vector<1x8x128xf32> to vector<8x128xf32>
      %129 = vector.shape_cast %126 : vector<8x128xf32> to vector<1x8x128xf32>
      tpu.vector_store %arg9[%c0_43, %c0_44, %c0_45], %129 {strides = array<i32>} : memref<1x8x128xf32, #tpu.memory_space<vmem>>, vector<1x8x128xf32>,
    } else {
    }
    %c0 = arith.constant 0 : index
    %c0_1 = arith.constant 0 : index
    %c0_2 = arith.constant 0 : index
    %3 = vector.load %arg2[%c0, %c0_1, %c0_2] : memref<1x3x256xbf16, #tpu.memory_space<vmem>>, vector<1x3x256xbf16>
    %4 = vector.shape_cast %3 : vector<1x3x256xbf16> to vector<3x256xbf16>
    %c0_3 = arith.constant 0 : index
    %c0_4 = arith.constant 0 : index
    %5 = vector.load %arg3[%c0_3, %c0_4] : memref<32x3xbf16, #tpu.memory_space<vmem>>, vector<32x3xbf16>
    %cst = arith.constant dense<0.000000e+00> : vector<32x256xf32>
    %6 = tpu.matmul %5, %4, %cst {dimension_numbers = #tpu.dot_dimension_numbers<[1], [0], [0], [1], [0, 0, 1, 1], [], []>} : vector<32x3xbf16>, vector<3x256xbf16>, vector<32x256xf32> -> vector<32x256xf32>
    %c0_5 = arith.constant 0 : index
    %c0_6 = arith.constant 0 : index
    %7 = vector.load %arg4[%c0_5, %c0_6] : memref<32x1xf32, #tpu.memory_space<vmem>>, vector<32x1xf32>
    %8 = vector.broadcast %7 : vector<32x1xf32> to vector<32x256xf32>
    %9 = arith.addf %6, %8 : vector<32x256xf32>
    %c0_7 = arith.constant 0 : index
    %c0_8 = arith.constant 0 : index
    %10 = vector.load %arg5[%c0_7, %c0_8] : memref<1x3xbf16, #tpu.memory_space<vmem>>, vector<1x3xbf16>
    %cst_9 = arith.constant dense<0.000000e+00> : vector<1x256xf32>
    %11 = tpu.matmul %10, %4, %cst_9 {dimension_numbers = #tpu.dot_dimension_numbers<[1], [0], [0], [1], [0, 0, 1, 1], [], []>} : vector<1x3xbf16>, vector<3x256xbf16>, vector<1x256xf32> -> vector<1x256xf32>
    %c0_10 = arith.constant 0 : index
    %c0_11 = arith.constant 0 : index
    %12 = vector.load %arg6[%c0_10, %c0_11] : memref<1x1xf32, #tpu.memory_space<vmem>>, vector<1x1xf32>
    %13 = vector.broadcast %12 : vector<1x1xf32> to vector<1x256xf32>
    %14 = arith.addf %11, %13 : vector<1x256xf32>
    %15 = arith.mulf %9, %9 : vector<32x256xf32>
    %cst_12 = arith.constant dense<0.000000e+00> : vector<256xf32>
    %16 = vector.multi_reduction <add>, %15, %cst_12 [0] : vector<32x256xf32> to vector<256xf32>
    %17 = vector.shape_cast %16 : vector<256xf32> to vector<1x256xf32>
    %cst_13 = arith.constant 1.000000e-24 : f32
    %18 = vector.broadcast %cst_13 : f32 to vector<1x256xf32>
    %19 = arith.maximumf %17, %18 : vector<1x256xf32>
    %20 = math.rsqrt %19 : vector<1x256xf32>
    %21 = vector.broadcast %20 : vector<1x256xf32> to vector<32x256xf32>
    %22 = arith.mulf %9, %21 : vector<32x256xf32>
    %23 = arith.truncf %22 : vector<32x256xf32> to vector<32x256xbf16>
    %c0_14 = arith.constant 0 : index
    %c0_15 = arith.constant 0 : index
    %c0_16 = arith.constant 0 : index
    %24 = vector.load %arg8[%c0_14, %c0_15, %c0_16] : memref<1x32x256xbf16, #tpu.memory_space<vmem>>, vector<1x32x256xbf16>
    %25 = vector.shape_cast %24 : vector<1x32x256xbf16> to vector<32x256xbf16>
    %26 = vector.shape_cast %23 : vector<32x256xbf16> to vector<1x32x256xbf16>
    tpu.vector_store %arg8[%c0_14, %c0_15, %c0_16], %26 {strides = array<i32>} : memref<1x32x256xbf16, #tpu.memory_space<vmem>>, vector<1x32x256xbf16>,
    %27 = tpu.iota {dimensions = array<i32: 1>} : vector<1x256xi32>
    %c256_i32 = arith.constant 256 : i32
    %28 = arith.muli %arg1, %c256_i32 : i32
    %29 = vector.broadcast %28 : i32 to vector<1x256xi32>
    %30 = arith.addi %27, %29 : vector<1x256xi32>
    %c256_i32_17 = arith.constant 256 : i32
    %31 = vector.broadcast %c256_i32_17 : i32 to vector<1x256xi32>
    %32 = arith.cmpi slt, %30, %31 : vector<1x256xi32>
    %33 = arith.extui %32 : vector<1x256xi1> to vector<1x256xi32>
    %34 = arith.sitofp %33 : vector<1x256xi32> to vector<1x256xf32>
    %c0_18 = arith.constant 0 : index
    %c0_19 = arith.constant 0 : index
    %c0_20 = arith.constant 0 : index
    %35 = vector.load %arg7[%c0_18, %c0_19, %c0_20] : memref<1x1x256xbf16, #tpu.memory_space<vmem>>, vector<1x1x256xbf16>
    %36 = vector.shape_cast %35 : vector<1x1x256xbf16> to vector<1x256xbf16>
    %37 = arith.extf %36 : vector<1x256xbf16> to vector<1x256xf32>
    %cst_21 = arith.constant 5.000000e-01 : f32
    %38 = vector.broadcast %cst_21 : f32 to vector<1x256xf32>
    %39 = arith.cmpf oge, %37, %38 : vector<1x256xf32>
    %40 = arith.extui %39 : vector<1x256xi1> to vector<1x256xi32>
    %41 = arith.sitofp %40 : vector<1x256xi32> to vector<1x256xf32>
    %cst_22 = arith.constant 0.000000e+00 : f32
    %42 = vector.broadcast %cst_22 : f32 to vector<1x256xf32>
    %43 = arith.cmpf oge, %14, %42 : vector<1x256xf32>
    %44 = arith.extui %43 : vector<1x256xi1> to vector<1x256xi32>
    %45 = arith.sitofp %44 : vector<1x256xi32> to vector<1x256xf32>
    %46 = arith.subf %41, %45 : vector<1x256xf32>
    %47 = arith.mulf %14, %46 : vector<1x256xf32>
    %cst_23 = arith.constant 2.000000e+00 : f32
    %48 = vector.broadcast %cst_23 : f32 to vector<1x256xf32>
    %49 = arith.mulf %48, %14 : vector<1x256xf32>
    %50 = arith.mulf %49, %45 : vector<1x256xf32>
    %51 = arith.subf %14, %50 : vector<1x256xf32>
    %52 = math.exp %51 : vector<1x256xf32>
    %cst_24 = arith.constant 1.000000e+00 : f32
    %53 = vector.broadcast %cst_24 : f32 to vector<1x256xf32>
    %54 = arith.addf %53, %52 : vector<1x256xf32>
    %55 = math.log %54 : vector<1x256xf32>
    %56 = arith.subf %47, %55 : vector<1x256xf32>
    %cst_25 = arith.constant 0.000000e+00 : f32
    %57 = vector.broadcast %cst_25 : f32 to vector<1x256xf32>
    %58 = arith.subf %57, %41 : vector<1x256xf32>
    %59 = arith.mulf %58, %56 : vector<1x256xf32>
    %60 = arith.mulf %59, %34 : vector<1x256xf32>
    %61 = vector.shape_cast %60 : vector<1x256xf32> to vector<1x1x256xf32>
    %cst_26 = arith.constant dense<0.000000e+00> : vector<1xf32>
    %62 = vector.multi_reduction <add>, %61, %cst_26 [1, 2] : vector<1x1x256xf32> to vector<1xf32>
    %63 = vector.shape_cast %62 : vector<1xf32> to vector<1x1x1xf32>
    %64 = vector.extract %63[0, 0, 0] : f32 from vector<1x1x1xf32>
    %65 = vector.broadcast %64 : f32 to vector<1x1xf32>
    %cst_27 = arith.constant 1.000000e+00 : f32
    %66 = vector.broadcast %cst_27 : f32 to vector<1x256xf32>
    %67 = arith.subf %66, %41 : vector<1x256xf32>
    %cst_28 = arith.constant 0.000000e+00 : f32
    %68 = vector.broadcast %cst_28 : f32 to vector<1x256xf32>
    %69 = arith.subf %68, %67 : vector<1x256xf32>
    %70 = arith.mulf %69, %56 : vector<1x256xf32>
    %71 = arith.mulf %70, %34 : vector<1x256xf32>
    %72 = vector.shape_cast %71 : vector<1x256xf32> to vector<1x1x256xf32>
    %cst_29 = arith.constant dense<0.000000e+00> : vector<1xf32>
    %73 = vector.multi_reduction <add>, %72, %cst_29 [1, 2] : vector<1x1x256xf32> to vector<1xf32>
    %74 = vector.shape_cast %73 : vector<1xf32> to vector<1x1x1xf32>
    %75 = vector.extract %74[0, 0, 0] : f32 from vector<1x1x1xf32>
    %76 = vector.broadcast %75 : f32 to vector<1x1xf32>
    %77 = arith.mulf %41, %34 : vector<1x256xf32>
    %78 = vector.shape_cast %77 : vector<1x256xf32> to vector<1x1x256xf32>
    %cst_30 = arith.constant dense<0.000000e+00> : vector<1xf32>
    %79 = vector.multi_reduction <add>, %78, %cst_30 [1, 2] : vector<1x1x256xf32> to vector<1xf32>
    %80 = vector.shape_cast %79 : vector<1xf32> to vector<1x1x1xf32>
    %81 = vector.extract %80[0, 0, 0] : f32 from vector<1x1x1xf32>
    %82 = vector.broadcast %81 : f32 to vector<1x1xf32>
    %cst_31 = arith.constant 1.000000e+00 : f32
    %83 = vector.broadcast %cst_31 : f32 to vector<1x256xf32>
    %84 = arith.subf %83, %41 : vector<1x256xf32>
    %85 = arith.mulf %84, %34 : vector<1x256xf32>
    %86 = vector.shape_cast %85 : vector<1x256xf32> to vector<1x1x256xf32>
    %cst_32 = arith.constant dense<0.000000e+00> : vector<1xf32>
    %87 = vector.multi_reduction <add>, %86, %cst_32 [1, 2] : vector<1x1x256xf32> to vector<1xf32>
    %88 = vector.shape_cast %87 : vector<1xf32> to vector<1x1x1xf32>
    %89 = vector.extract %88[0, 0, 0] : f32 from vector<1x1x1xf32>
    %90 = vector.broadcast %89 : f32 to vector<1x1xf32>
    %91 = tpu.iota {dimensions = array<i32: 1>} : vector<8x128xi32>
    %92 = tpu.iota {dimensions = array<i32: 0>} : vector<8x128xi32>
    %c0_i32_33 = arith.constant 0 : i32
    %93 = vector.broadcast %c0_i32_33 : i32 to vector<8x128xi32>
    %94 = arith.cmpi eq, %92, %93 : vector<8x128xi32>
    %c0_i32_34 = arith.constant 0 : i32
    %95 = vector.broadcast %c0_i32_34 : i32 to vector<8x128xi32>
    %96 = arith.cmpi eq, %91, %95 : vector<8x128xi32>
    %97 = arith.andi %94, %96 : vector<8x128xi1>
    %cst_35 = arith.constant 0.000000e+00 : f32
    %98 = vector.shape_cast %65 : vector<1x1xf32> to vector<1x1xf32>
    %99 = vector.broadcast %98 : vector<1x1xf32> to vector<8x128xf32>
    %100 = vector.broadcast %cst_35 : f32 to vector<8x128xf32>
    %101 = arith.select %97, %99, %100 : vector<8x128xi1>, vector<8x128xf32>
    %c1_i32 = arith.constant 1 : i32
    %102 = vector.broadcast %c1_i32 : i32 to vector<8x128xi32>
    %103 = arith.cmpi eq, %91, %102 : vector<8x128xi32>
    %104 = arith.andi %94, %103 : vector<8x128xi1>
    %105 = vector.shape_cast %76 : vector<1x1xf32> to vector<1x1xf32>
    %106 = vector.broadcast %105 : vector<1x1xf32> to vector<8x128xf32>
    %107 = arith.select %104, %106, %101 : vector<8x128xi1>, vector<8x128xf32>
    %c2_i32 = arith.constant 2 : i32
    %108 = vector.broadcast %c2_i32 : i32 to vector<8x128xi32>
    %109 = arith.cmpi eq, %91, %108 : vector<8x128xi32>
    %110 = arith.andi %94, %109 : vector<8x128xi1>
    %111 = vector.shape_cast %82 : vector<1x1xf32> to vector<1x1xf32>
    %112 = vector.broadcast %111 : vector<1x1xf32> to vector<8x128xf32>
    %113 = arith.select %110, %112, %107 : vector<8x128xi1>, vector<8x128xf32>
    %c3_i32 = arith.constant 3 : i32
    %114 = vector.broadcast %c3_i32 : i32 to vector<8x128xi32>
    %115 = arith.cmpi eq, %91, %114 : vector<8x128xi32>
    %116 = arith.andi %94, %115 : vector<8x128xi1>
    %117 = vector.shape_cast %90 : vector<1x1xf32> to vector<1x1xf32>
    %118 = vector.broadcast %117 : vector<1x1xf32> to vector<8x128xf32>
    %119 = arith.select %116, %118, %113 : vector<8x128xi1>, vector<8x128xf32>
    %c0_36 = arith.constant 0 : index
    %c0_37 = arith.constant 0 : index
    %c0_38 = arith.constant 0 : index
    %120 = vector.load %arg9[%c0_36, %c0_37, %c0_38] : memref<1x8x128xf32, #tpu.memory_space<vmem>>, vector<1x8x128xf32>
    %121 = vector.shape_cast %120 : vector<1x8x128xf32> to vector<8x128xf32>
    %122 = arith.addf %121, %119 : vector<8x128xf32>
    %c0_39 = arith.constant 0 : index
    %c0_40 = arith.constant 0 : index
    %c0_41 = arith.constant 0 : index
    %123 = vector.load %arg9[%c0_39, %c0_40, %c0_41] : memref<1x8x128xf32, #tpu.memory_space<vmem>>, vector<1x8x128xf32>
    %124 = vector.shape_cast %123 : vector<1x8x128xf32> to vector<8x128xf32>
    %125 = vector.shape_cast %122 : vector<8x128xf32> to vector<1x8x128xf32>
    tpu.vector_store %arg9[%c0_39, %c0_40, %c0_41], %125 {strides = array<i32>} : memref<1x8x128xf32, #tpu.memory_space<vmem>>, vector<1x8x128xf32>,
    return
  }
  func.func @transform_0(%arg0: i32, %arg1: i32) -> (i32, i32, i32) {
    %c0_i32 = arith.constant 0 : i32
    %c0_i32_0 = arith.constant 0 : i32
    return %arg0, %c0_i32, %arg1 : i32, i32, i32
  }
  func.func @transform_1(%arg0: i32, %arg1: i32) -> (i32, i32) {
    %c0_i32 = arith.constant 0 : i32
    %c0_i32_0 = arith.constant 0 : i32
    %c0_i32_1 = arith.constant 0 : i32
    return %c0_i32, %c0_i32_0 : i32, i32
  }
  func.func @transform_2(%arg0: i32, %arg1: i32) -> (i32, i32) {
    %c0_i32 = arith.constant 0 : i32
    %c0_i32_0 = arith.constant 0 : i32
    %c0_i32_1 = arith.constant 0 : i32
    return %c0_i32, %c0_i32_0 : i32, i32
  }
  func.func @transform_3(%arg0: i32, %arg1: i32) -> (i32, i32) {
    %c0_i32 = arith.constant 0 : i32
    %c0_i32_0 = arith.constant 0 : i32
    %c0_i32_1 = arith.constant 0 : i32
    return %c0_i32, %c0_i32_0 : i32, i32
  }
  func.func @transform_4(%arg0: i32, %arg1: i32) -> (i32, i32) {
    %c0_i32 = arith.constant 0 : i32
    %c0_i32_0 = arith.constant 0 : i32
    %c0_i32_1 = arith.constant 0 : i32
    return %c0_i32, %c0_i32_0 : i32, i32
  }
  func.func @transform_5(%arg0: i32, %arg1: i32) -> (i32, i32, i32) {
    %c0_i32 = arith.constant 0 : i32
    %c0_i32_0 = arith.constant 0 : i32
    return %arg0, %c0_i32, %arg1 : i32, i32, i32
  }
  func.func @transform_6(%arg0: i32, %arg1: i32) -> (i32, i32, i32) {
    %c0_i32 = arith.constant 0 : i32
    %c0_i32_0 = arith.constant 0 : i32
    return %arg0, %c0_i32, %arg1 : i32, i32, i32
  }
  func.func @transform_7(%arg0: i32, %arg1: i32) -> (i32, i32, i32) {
    %c0_i32 = arith.constant 0 : i32
    %c0_i32_0 = arith.constant 0 : i32
    %c0_i32_1 = arith.constant 0 : i32
    return %arg0, %c0_i32, %c0_i32_0 : i32, i32, i32
  }
}

module attributes {stable_mosaic.version = 11 : i64} {
  func.func @k_proto_kernel(%arg0: i32, %arg1: i32, %arg2: memref<1x3x256xbf16, #tpu.memory_space<vmem>>, %arg3: memref<32x3xbf16, #tpu.memory_space<vmem>>, %arg4: memref<32x1xf32, #tpu.memory_space<vmem>>, %arg5: memref<1x1x256xbf16, #tpu.memory_space<vmem>>, %arg6: memref<1x1x32xf32, #tpu.memory_space<vmem>>) attributes {dimension_semantics = [#tpu.dimension_semantics<parallel>, #tpu.dimension_semantics<arbitrary>], iteration_bounds = array<i64: 2, 1>, scalar_prefetch = 0 : i64, scratch_operands = 0 : i64, tpu.core_type = #tpu.core_type<tc>, window_params = [{transform_indices = @transform_0, window_bounds = array<i64: 1, 3, 256>}, {pipeline_mode = #tpu.pipeline_mode<synchronous>, transform_indices = @transform_1, window_bounds = array<i64: 32, 3>}, {pipeline_mode = #tpu.pipeline_mode<synchronous>, transform_indices = @transform_2, window_bounds = array<i64: 32, 1>}, {transform_indices = @transform_3, window_bounds = array<i64: 1, 1, 256>}, {transform_indices = @transform_4, window_bounds = array<i64: 1, 1, 32>}]} {
    %c0_i32 = arith.constant 0 : i32
    %0 = arith.cmpi eq, %arg1, %c0_i32 : i32
    %1 = arith.extui %0 : i1 to i32
    %c0_i32_0 = arith.constant 0 : i32
    %2 = arith.cmpi ne, %1, %c0_i32_0 : i32
    scf.if %2 {
      %cst_19 = arith.constant 0.000000e+00 : f32
      %28 = vector.broadcast %cst_19 : f32 to vector<1x32xf32>
      %c0_20 = arith.constant 0 : index
      %c0_21 = arith.constant 0 : index
      %c0_22 = arith.constant 0 : index
      %29 = vector.load %arg6[%c0_20, %c0_21, %c0_22] : memref<1x1x32xf32, #tpu.memory_space<vmem>>, vector<1x1x32xf32>
      %30 = vector.shape_cast %29 : vector<1x1x32xf32> to vector<1x32xf32>
      %31 = vector.shape_cast %28 : vector<1x32xf32> to vector<1x1x32xf32>
      tpu.vector_store %arg6[%c0_20, %c0_21, %c0_22], %31 {strides = array<i32>} : memref<1x1x32xf32, #tpu.memory_space<vmem>>, vector<1x1x32xf32>,
    } else {
    }
    %c0 = arith.constant 0 : index
    %c0_1 = arith.constant 0 : index
    %3 = vector.load %arg3[%c0, %c0_1] : memref<32x3xbf16, #tpu.memory_space<vmem>>, vector<32x3xbf16>
    %c0_2 = arith.constant 0 : index
    %c0_3 = arith.constant 0 : index
    %c0_4 = arith.constant 0 : index
    %4 = vector.load %arg2[%c0_2, %c0_3, %c0_4] : memref<1x3x256xbf16, #tpu.memory_space<vmem>>, vector<1x3x256xbf16>
    %5 = vector.shape_cast %4 : vector<1x3x256xbf16> to vector<3x256xbf16>
    %cst = arith.constant dense<0.000000e+00> : vector<32x256xf32>
    %6 = tpu.matmul %3, %5, %cst {dimension_numbers = #tpu.dot_dimension_numbers<[1], [0], [0], [1], [0, 0, 1, 1], [], []>} : vector<32x3xbf16>, vector<3x256xbf16>, vector<32x256xf32> -> vector<32x256xf32>
    %c0_5 = arith.constant 0 : index
    %c0_6 = arith.constant 0 : index
    %7 = vector.load %arg4[%c0_5, %c0_6] : memref<32x1xf32, #tpu.memory_space<vmem>>, vector<32x1xf32>
    %8 = vector.broadcast %7 : vector<32x1xf32> to vector<32x256xf32>
    %9 = arith.addf %6, %8 : vector<32x256xf32>
    %10 = arith.mulf %9, %9 : vector<32x256xf32>
    %cst_7 = arith.constant dense<0.000000e+00> : vector<256xf32>
    %11 = vector.multi_reduction <add>, %10, %cst_7 [0] : vector<32x256xf32> to vector<256xf32>
    %12 = vector.shape_cast %11 : vector<256xf32> to vector<1x256xf32>
    %cst_8 = arith.constant 1.000000e-24 : f32
    %13 = vector.broadcast %cst_8 : f32 to vector<1x256xf32>
    %14 = arith.maximumf %12, %13 : vector<1x256xf32>
    %15 = math.rsqrt %14 : vector<1x256xf32>
    %16 = vector.broadcast %15 : vector<1x256xf32> to vector<32x256xf32>
    %17 = arith.mulf %9, %16 : vector<32x256xf32>
    %c0_9 = arith.constant 0 : index
    %c0_10 = arith.constant 0 : index
    %c0_11 = arith.constant 0 : index
    %18 = vector.load %arg5[%c0_9, %c0_10, %c0_11] : memref<1x1x256xbf16, #tpu.memory_space<vmem>>, vector<1x1x256xbf16>
    %19 = vector.shape_cast %18 : vector<1x1x256xbf16> to vector<1x256xbf16>
    %20 = arith.extf %19 : vector<1x256xbf16> to vector<1x256xf32>
    %cst_12 = arith.constant dense<0.000000e+00> : vector<1x32xf32>
    %21 = tpu.matmul %20, %17, %cst_12 {dimension_numbers = #tpu.dot_dimension_numbers<[1], [1], [0], [0], [0, 0, 1, 0], [], []>} : vector<1x256xf32>, vector<32x256xf32>, vector<1x32xf32> -> vector<1x32xf32>
    %c0_13 = arith.constant 0 : index
    %c0_14 = arith.constant 0 : index
    %c0_15 = arith.constant 0 : index
    %22 = vector.load %arg6[%c0_13, %c0_14, %c0_15] : memref<1x1x32xf32, #tpu.memory_space<vmem>>, vector<1x1x32xf32>
    %23 = vector.shape_cast %22 : vector<1x1x32xf32> to vector<1x32xf32>
    %24 = arith.addf %23, %21 : vector<1x32xf32>
    %c0_16 = arith.constant 0 : index
    %c0_17 = arith.constant 0 : index
    %c0_18 = arith.constant 0 : index
    %25 = vector.load %arg6[%c0_16, %c0_17, %c0_18] : memref<1x1x32xf32, #tpu.memory_space<vmem>>, vector<1x1x32xf32>
    %26 = vector.shape_cast %25 : vector<1x1x32xf32> to vector<1x32xf32>
    %27 = vector.shape_cast %24 : vector<1x32xf32> to vector<1x1x32xf32>
    tpu.vector_store %arg6[%c0_16, %c0_17, %c0_18], %27 {strides = array<i32>} : memref<1x1x32xf32, #tpu.memory_space<vmem>>, vector<1x1x32xf32>,
    return
  }
  func.func @transform_0(%arg0: i32, %arg1: i32) -> (i32, i32, i32) {
    %c0_i32 = arith.constant 0 : i32
    %c0_i32_0 = arith.constant 0 : i32
    return %arg0, %c0_i32, %arg1 : i32, i32, i32
  }
  func.func @transform_1(%arg0: i32, %arg1: i32) -> (i32, i32) {
    %c0_i32 = arith.constant 0 : i32
    %c0_i32_0 = arith.constant 0 : i32
    %c0_i32_1 = arith.constant 0 : i32
    return %c0_i32, %c0_i32_0 : i32, i32
  }
  func.func @transform_2(%arg0: i32, %arg1: i32) -> (i32, i32) {
    %c0_i32 = arith.constant 0 : i32
    %c0_i32_0 = arith.constant 0 : i32
    %c0_i32_1 = arith.constant 0 : i32
    return %c0_i32, %c0_i32_0 : i32, i32
  }
  func.func @transform_3(%arg0: i32, %arg1: i32) -> (i32, i32, i32) {
    %c0_i32 = arith.constant 0 : i32
    %c0_i32_0 = arith.constant 0 : i32
    return %arg0, %c0_i32, %arg1 : i32, i32, i32
  }
  func.func @transform_4(%arg0: i32, %arg1: i32) -> (i32, i32, i32) {
    %c0_i32 = arith.constant 0 : i32
    %c0_i32_0 = arith.constant 0 : i32
    %c0_i32_1 = arith.constant 0 : i32
    return %arg0, %c0_i32, %c0_i32_0 : i32, i32, i32
  }
}

module attributes {stable_mosaic.version = 11 : i64} {
  func.func @logits_kernel(%arg0: i32, %arg1: i32, %arg2: memref<512x32xbf16, #tpu.memory_space<vmem>>, %arg3: memref<32x128xf32, #tpu.memory_space<vmem>>, %arg4: memref<32x128xf32, #tpu.memory_space<vmem>>, %arg5: memref<512x128xf32, #tpu.memory_space<vmem>>, %arg6: memref<512x128xf32, #tpu.memory_space<vmem>>) attributes {dimension_semantics = [#tpu.dimension_semantics<parallel>, #tpu.dimension_semantics<arbitrary>], iteration_bounds = array<i64: 1, 1>, scalar_prefetch = 0 : i64, scratch_operands = 0 : i64, tpu.core_type = #tpu.core_type<tc>, window_params = [{transform_indices = @transform_0, window_bounds = array<i64: 512, 32>}, {pipeline_mode = #tpu.pipeline_mode<synchronous>, transform_indices = @transform_1, window_bounds = array<i64: 32, 128>}, {transform_indices = @transform_2, window_bounds = array<i64: 32, 128>}, {transform_indices = @transform_3, window_bounds = array<i64: 512, 128>}, {transform_indices = @transform_4, window_bounds = array<i64: 512, 128>}]} {
    %c0 = arith.constant 0 : index
    %c0_0 = arith.constant 0 : index
    %0 = vector.load %arg2[%c0, %c0_0] : memref<512x32xbf16, #tpu.memory_space<vmem>>, vector<512x32xbf16>
    %c0_i32 = arith.constant 0 : i32
    %1 = arith.cmpi eq, %arg1, %c0_i32 : i32
    %2 = arith.extui %1 : i1 to i32
    %c0_i32_1 = arith.constant 0 : i32
    %3 = arith.cmpi ne, %2, %c0_i32_1 : i32
    scf.if %3 {
      %c0_7 = arith.constant 0 : index
      %c0_8 = arith.constant 0 : index
      %10 = vector.load %arg3[%c0_7, %c0_8] : memref<32x128xf32, #tpu.memory_space<vmem>>, vector<32x128xf32>
      %11 = arith.truncf %10 : vector<32x128xf32> to vector<32x128xbf16>
      %cst_9 = arith.constant dense<0.000000e+00> : vector<512x128xf32>
      %12 = tpu.matmul %0, %11, %cst_9 {dimension_numbers = #tpu.dot_dimension_numbers<[1], [0], [0], [1], [0, 0, 1, 1], [], []>} : vector<512x32xbf16>, vector<32x128xbf16>, vector<512x128xf32> -> vector<512x128xf32>
      %cst_10 = arith.constant 14.2857141 : f32
      %13 = vector.broadcast %cst_10 : f32 to vector<512x128xf32>
      %14 = arith.mulf %12, %13 : vector<512x128xf32>
      %c0_11 = arith.constant 0 : index
      %c0_12 = arith.constant 0 : index
      %15 = vector.load %arg5[%c0_11, %c0_12] : memref<512x128xf32, #tpu.memory_space<vmem>>, vector<512x128xf32>
      tpu.vector_store %arg5[%c0_11, %c0_12], %14 {strides = array<i32>} : memref<512x128xf32, #tpu.memory_space<vmem>>, vector<512x128xf32>,
    } else {
    }
    %c0_2 = arith.constant 0 : index
    %c0_3 = arith.constant 0 : index
    %4 = vector.load %arg4[%c0_2, %c0_3] : memref<32x128xf32, #tpu.memory_space<vmem>>, vector<32x128xf32>
    %5 = arith.truncf %4 : vector<32x128xf32> to vector<32x128xbf16>
    %cst = arith.constant dense<0.000000e+00> : vector<512x128xf32>
    %6 = tpu.matmul %0, %5, %cst {dimension_numbers = #tpu.dot_dimension_numbers<[1], [0], [0], [1], [0, 0, 1, 1], [], []>} : vector<512x32xbf16>, vector<32x128xbf16>, vector<512x128xf32> -> vector<512x128xf32>
    %cst_4 = arith.constant 14.2857141 : f32
    %7 = vector.broadcast %cst_4 : f32 to vector<512x128xf32>
    %8 = arith.mulf %6, %7 : vector<512x128xf32>
    %c0_5 = arith.constant 0 : index
    %c0_6 = arith.constant 0 : index
    %9 = vector.load %arg6[%c0_5, %c0_6] : memref<512x128xf32, #tpu.memory_space<vmem>>, vector<512x128xf32>
    tpu.vector_store %arg6[%c0_5, %c0_6], %8 {strides = array<i32>} : memref<512x128xf32, #tpu.memory_space<vmem>>, vector<512x128xf32>,
    return
  }
  func.func @transform_0(%arg0: i32, %arg1: i32) -> (i32, i32) {
    %c0_i32 = arith.constant 0 : i32
    %c0_i32_0 = arith.constant 0 : i32
    return %arg0, %c0_i32 : i32, i32
  }
  func.func @transform_1(%arg0: i32, %arg1: i32) -> (i32, i32) {
    %c0_i32 = arith.constant 0 : i32
    %c0_i32_0 = arith.constant 0 : i32
    %c0_i32_1 = arith.constant 0 : i32
    return %c0_i32, %c0_i32_0 : i32, i32
  }
  func.func @transform_2(%arg0: i32, %arg1: i32) -> (i32, i32) {
    %c0_i32 = arith.constant 0 : i32
    %c0_i32_0 = arith.constant 0 : i32
    return %c0_i32, %arg1 : i32, i32
  }
  func.func @transform_3(%arg0: i32, %arg1: i32) -> (i32, i32) {
    %c0_i32 = arith.constant 0 : i32
    %c0_i32_0 = arith.constant 0 : i32
    return %arg0, %c0_i32 : i32, i32
  }
  func.func @transform_4(%arg0: i32, %arg1: i32) -> (i32, i32) {
    %c0_i32 = arith.constant 0 : i32
    return %arg0, %arg1 : i32, i32
  }
}

</mosaic_0001>

<bundles_post_ra>
// kernel: contrastive_forward.4
= control target key start
LH: loop header
LB: loop body
LE: loop exit
PB: predicated region body
PF: predicated region fallthrough
CT: control target
= control target key end

     0   :  { %s692_s15 = smov 0   ;;  %s694_s16 = smov 0   ;;  %s761_s0 = inlined_call_operand.vmem [shape: bf16[2,3,256], index: 0, kind: input, shape index: {}]   ;;  %s762_s1 = inlined_call_operand.vmem [shape: bf16[32,3], index: 1, kind: input, shape index: {}]   ;;  %s763_s2 = inlined_call_operand.vmem [shape: f32[32,1], index: 2, kind: input, shape index: {}]   ;;  %s764_s3 = inlined_call_operand.vmem [shape: bf16[2,1,256], index: 3, kind: input, shape index: {}]   ;;  %s765_s4 = inlined_call_operand.vmem [shape: f32[2,1,32], index: 4, kind: output, shape index: {}]  }
   0x1   :  { %s696_s17 = smov 0  }
   0x2 LB: > { %s26_s18 = sadd.s32 1, %s658_s16  ;;  %p585_p0 = scmp.ge.s32.totalorder %s662_s17, 1  ;;  %s662_s17 = sphi %s696_s17, %s14_s17   ;;  %s658_s16 = sphi %s694_s16, %s767_s16   ;;  %s654_s15 = sphi %s692_s15, %s766_s15  }
   0x3   : > { %p28_p1 = scmp.ge.s32.totalorder %s26_s18, 2  ;;  %p197_p2 = scmp.lt.s32.totalorder %s662_s17, 3 }
   0x5   : > { %s769_s18 = smov (%p28_p1, %s26_s18), 0  ;;  %p198_p3 = pnand %p585_p0, %p197_p2 }
   0x6   : > { %p234_p4 = scmp.lt.s32.totalorder (!%p198_p3), %s654_s15, 1  ;;  %vm317_vm0 = vcmask (!%p198_p3), 1040384   ;;  %vm318_vm1 = vcmask (!%p198_p3), 1041408   ;;  %v664_v0 = vmov (!%p198_p3), 0   ;;  %v665_v1 = vmov (!%p198_p3), 65535   ;;  %v267_v3 = vld [vmem:[%s763_s2] sm:$0xff] (!%p198_p3) }
   0x7   : > { %201 = sbr.rel (%p198_p3) target bundleno = 515 (0x203), region = 36  ;;  %359 = vmatprep.mubr.bf16.mxu0 (!%p198_p3), %v664_v0  ;;  %632 = vset.pattern.permute.xlu0 (!%p198_p3), %v664_v0  ;;  %v319_v2 = vsel (!%p198_p3), %vm317_vm0, 4294967295, %v665_v1  ;;  %v269_v4 = vld [vmem:[%s763_s2 + $0x10] sm:$0xff] (!%p198_p3)  ;;  %v268_v6 = vld [vmem:[%s763_s2 + $0x8] sm:$0xff] (!%p198_p3)  ;;  %v270_v8 = vld [vmem:[%s763_s2 + $0x18] sm:$0xff] (!%p198_p3)  ;;  %vm310_vm2 = vcmask (!%p198_p3), 23552   ;;  %v421_v14 = vlaneseq (!%p198_p3) }
   0x8   : > { %633 = vset.pattern.permute.xlu1 (!%p198_p3), %v664_v0  ;;  %273 = vperm.xlu0 (!%p198_p3), %632, %v267_v3   ;;  %v320_v5 = vsel (!%p198_p3), %vm318_vm1, %v319_v2, 0  ;;  %v634_v12 = vld [vmem:[%s762_s1] sm:$0xff] (!%p198_p3)   ;;  %v635_v13 = vld [vmem:[%s762_s1 + $0x8] sm:$0xff] (!%p198_p3)   ;;  %vm260_vm3 = vcmask (!%p198_p3), 253952   ;;  %v666_v22 = vmov (!%p198_p3), 0.0  }
   0x9   : > { %283 = vperm.xlu1 (!%p198_p3), %633, %v269_v4   ;;  %v422_v15 = vshrl.u32 (!%p198_p3), %v421_v14, 7 }
   0xb   : > { %v427_v18 = vsub.s32 (!%p198_p3), 2, %v422_v15  ;;  %v423_v19 = vsub.s32 (!%p198_p3), 0, %v422_v15 }
   0xc   : > { %278 = vperm.xlu0 (!%p198_p3), %632, %v268_v6  }
   0xd   : > { %288 = vperm.xlu1 (!%p198_p3), %633, %v270_v8  }
   0xe   : > { %s771_s15 = smov (!%p234_p4, %s654_s15), 1 }
   0xf   : > { %s596_s21 = sshll.u32 %s771_s15, 2  ;;  %s588_s9 = sshll.u32 %s771_s15, 1 }
  0x10   : > { %s241_s26 = scalar_lea.vmem %s761_s0, %s596_s21  ;;  %s250_s12 = scalar_lea.vmem %s764_s3, %s588_s9 }
  0x11   : > { %v591_v7 = vld.sshfl [vmem:[%s241_s26] sm:$0x33 pattern:$0x76325410]  ;;  %s744_s19 = scalar_lea.vmem %s765_s4, %s771_s15 }
  0x12   : > { %v309_v9 = vcombine.high %v591_v7, %v591_v7  ;;  %v322_v10 = vand.u32 %v591_v7, %v320_v5  ;;  %v418_v16 = vld [vmem:[%s250_s12] sm:$0x3]  ;;  %261 = vst.msk [vmem:[%s744_s19] sm:$0x1] %vm260_vm3, %v666_v22 }
  0x13   : > { %v419_v17 = vunpack.c.l.bf16 %v418_v16 }
  0x14   : > { %v325_v11 = vand.u32 %v320_v5, %v309_v9 }
  0x15   : > { %v428_v20 = vrot.slane %v419_v17, %v427_v18  ;;  %v738_v21 = vrot.slane %v419_v17, %v423_v19 }
  0x16   : > { %327 = vmatprep.subr.bf16.mxu0 %v325_v11 }
  0x17   : > { %328 = vmatpush1.bf16.msra.mxu0 %v322_v10  ;;  %495 = vmatprep.mubr.f32.mxu1 %v428_v20 }
  0x19   : > { %v501_v22 = vld [vmem:[%s744_s19] sm:$0x1] }
  0x1a   : > { %592 = vmatmul.mubr.msk.bf16.vlgmr.msra.gmra.mrb[0].mxu0 %vm310_vm2, %v634_v12 }
  0x1b   : > { %369 = vmatprep.mubr.bf16.mxu0 %v664_v0 }
  0x22   : > { %593 = vmatmul.mubr.msk.bf16.gmra.mrb[4].mxu0 %vm310_vm2, %v635_v13 }
  0x87   : > { %v274_v23 = vpop.permute.xlu0 %273 }
  0x88   : > { %v284_v32 = vpop.permute.xlu1 %283 }
  0x8b   : > { %v279_v25 = vpop.permute.xlu0 %278 }
  0x8c   : > { %v289_v43 = vpop.permute.xlu1 %288 }
  0xed   : > { %v361_v24 = vpop.f32.mrb[0].mxu0 }
  0xee   : > { %v362_v26 = vadd.f32 %v361_v24, %v274_v23  ;;  %v363_v27 = vpop.f32.mrb[1].mxu0 }
  0xef   : > { %v364_v28 = vadd.f32 %v363_v27, %v274_v23  ;;  %v365_v29 = vpop.f32.mrb[2].mxu0 }
  0xf0   : > { %v366_v30 = vadd.f32 %v365_v29, %v279_v25  ;;  %v367_v31 = vpop.f32.mrb[3].mxu0  ;;  %v380_v34 = vmul.f32 %v362_v26, %v362_v26 }
  0xf1   : > { %v368_v33 = vadd.f32 %v367_v31, %v279_v25  ;;  %v381_v36 = vmul.f32 %v364_v28, %v364_v28 }
  0xf2   : > { %v382_v35 = vmul.f32 %v366_v30, %v366_v30 }
  0xf3   : > { %v383_v37 = vmul.f32 %v368_v33, %v368_v33 }
  0xf4   : > { %v388_v38 = vadd.f32 %v382_v35, %v380_v34 }
  0xf5   : > { %v397_v39 = vadd.f32 %v383_v37, %v381_v36  ;;  %v371_v40 = vpop.f32.mrb[4].mxu0 }
  0xf6   : > { %v372_v41 = vadd.f32 %v371_v40, %v284_v32  ;;  %v373_v42 = vpop.f32.mrb[5].mxu0 }
  0xf7   : > { %v374_v44 = vadd.f32 %v373_v42, %v284_v32  ;;  %v375_v45 = vpop.f32.mrb[6].mxu0 }
  0xf8   : > { %v384_v46 = vmul.f32 %v372_v41, %v372_v41  ;;  %v376_v47 = vadd.f32 %v375_v45, %v289_v43  ;;  %v377_v48 = vpop.f32.mrb[7].mxu0 }
  0xf9   : > { %v385_v49 = vmul.f32 %v374_v44, %v374_v44  ;;  %v378_v50 = vadd.f32 %v377_v48, %v289_v43 }
  0xfa   : > { %v389_v51 = vadd.f32 %v388_v38, %v384_v46  ;;  %v386_v52 = vmul.f32 %v376_v47, %v376_v47 }
  0xfb   : > { %v398_v53 = vadd.f32 %v397_v39, %v385_v49  ;;  %v387_v54 = vmul.f32 %v378_v50, %v378_v50 }
  0xfc   : > { %v390_v55 = vadd.f32 %v389_v51, %v386_v52 }
  0xfd   : > { %v399_v56 = vadd.f32 %v398_v53, %v387_v54 }
  0xfe   : > { %v391_v57 = vrot.slane %v390_v55, 4 }
  0xff   : > { %v400_v58 = vrot.slane %v399_v56, 4 }
 0x100   : > { %v392_v59 = vadd.f32 %v391_v57, %v390_v55 }
 0x101   : > { %v401_v60 = vadd.f32 %v400_v58, %v399_v56 }
 0x102   : > { %v393_v61 = vrot.slane %v392_v59, 2 }
 0x103   : > { %v402_v62 = vrot.slane %v401_v60, 2 }
 0x104   : > { %v394_v63 = vadd.f32 %v393_v61, %v392_v59 }
 0x105   : > { %v403_v0 = vadd.f32 %v402_v62, %v401_v60 }
 0x106   : > { %v395_v1 = vrot.slane %v394_v63, 1 }
 0x107   : > { %v404_v2 = vrot.slane %v403_v0, 1 }
 0x108   : > { %v396_v3 = vadd.f32 %v395_v1, %v394_v63 }
 0x109   : > { %v405_v4 = vadd.f32 %v404_v2, %v403_v0 }
 0x10a   : > { %v406_v5 = vmax.f32 %v396_v3, 1e-24 }
 0x10b   : > { %v407_v6 = vmax.f32 %v405_v4, 1e-24 }
 0x10c   : > { %636 = vrsqrt.f32 %v406_v5 }
 0x10d   : > { %638 = vrsqrt.f32 %v407_v6 }
 0x116   : > { %v637_v7 = vpop.eup %636 }
 0x117   : > { %v639_v8 = vpop.eup %638  ;;  %v416_v9 = vmul.f32 %v637_v7, %v376_v47  ;;  %v410_v10 = vmul.f32 %v637_v7, %v362_v26  ;;  %v412_v11 = vmul.f32 %v637_v7, %v366_v30  ;;  %v414_v12 = vmul.f32 %v637_v7, %v372_v41 }
 0x118   : > { %v417_v13 = vmul.f32 %v639_v8, %v378_v50  ;;  %v411_v14 = vmul.f32 %v639_v8, %v364_v28  ;;  %v413_v15 = vmul.f32 %v639_v8, %v368_v33  ;;  %v415_v16 = vmul.f32 %v639_v8, %v374_v44 }
 0x119   : > { %v599_v17 = vpack.c.bf16 %v412_v11, %v410_v10  ;;  %v603_v18 = vpack.c.bf16 %v416_v9, %v414_v12 }
 0x11a   : > { %v597_v19 = vpack.c.bf16 %v413_v15, %v411_v14  ;;  %v601_v20 = vpack.c.bf16 %v417_v13, %v415_v16 }
 0x11c   : > { %598 = vmatprep.subr.bf16.mxu1 %v597_v19 }
 0x11d   : > { %600 = vmatpush1.bf16.xpose.msra.mxu1 %v599_v17 }
 0x11e   : > { %602 = vmatprep.subr.bf16.mxu1 %v601_v20 }
 0x125   : > { %604 = vmatpush1.bf16.xpose.msra.mxu1 %v603_v18 }
 0x12c   : > { %496 = vmatmul.mubr.f32.vlgmr.msra.gmra.mrb[0].mxu1 %v738_v21 }
 0x1ff   : > { %v497_v23 = vpop.f32.mrb[0].mxu1 }
 0x200   : > { %v502_v24 = vadd.f32 %v501_v22, %v497_v23  ;;  %v499_v25 = vpop.f32.mrb[1].mxu1 }
 0x202   : > { %504 = vst.msk [vmem:[%s744_s19] sm:$0x1] %vm260_vm3, %v502_v24 }
 0x203 PF: > { %s14_s17 = sadd.s32 1, %s662_s17   ;;  %s766_s15 = smov %s658_s16 }
 0x204   : > { %p11_p5 = scmp.ge.s32.totalorder %s14_s17, 4   ;;  %s767_s16 = smov %s769_s18 }
 0x206   :  { %13 = sbr.rel (!%p11_p5) target bundleno = 2 (0x2), region = 73 }

// kernel: contrastive_forward.3
= control target key start
LH: loop header
LB: loop body
LE: loop exit
PB: predicated region body
PF: predicated region fallthrough
CT: control target
= control target key end

     0   :  { %s1111_s26 = smov 0   ;;  %s1113_s27 = smov 0   ;;  %s1257_s0 = inlined_call_operand.vmem [shape: bf16[2,3,256], index: 0, kind: input, shape index: {}]   ;;  %s1258_s1 = inlined_call_operand.vmem [shape: bf16[32,3], index: 1, kind: input, shape index: {}]   ;;  %s1259_s2 = inlined_call_operand.vmem [shape: f32[32,1], index: 2, kind: input, shape index: {}]   ;;  %s1260_s3 = inlined_call_operand.vmem [shape: bf16[1,3], index: 3, kind: input, shape index: {}]   ;;  %s1261_s4 = inlined_call_operand.<no memory space> [shape: f32[1,1], index: 4, kind: input, shape index: {}]   ;;  %s1262_s5 = inlined_call_operand.vmem [shape: bf16[2,1,256], index: 5, kind: input, shape index: {}]   ;;  %s1263_s6 = inlined_call_operand.vmem [shape: bf16[2,32,256], index: 6, kind: output, shape index: {0}]   ;;  %s1264_s7 = inlined_call_operand.vmem [shape: f32[2,8,128], index: 7, kind: output, shape index: {1}]  }
   0x1   :  { %v13_v0 = vstv %s1261_s4  ;;  %s1115_s28 = smov 0  }
   0x2   :  { %14 = vst [vmem:[#allocation2] sm:$0x1] %v13_v0 }
   0x3 LB: > { %s32_s4 = sadd.s32 1, %s1057_s27  ;;  %p958_p0 = scmp.ge.s32.totalorder %s1061_s28, 1  ;;  %s1061_s28 = sphi %s1115_s28, %s20_s28   ;;  %s1057_s27 = sphi %s1113_s27, %s1266_s27   ;;  %s1053_s26 = sphi %s1111_s26, %s1265_s26  }
   0x4   : > { %p34_p1 = scmp.ge.s32.totalorder %s32_s4, 2  ;;  %p279_p2 = scmp.lt.s32.totalorder %s1061_s28, 3 }
   0x6   : > { %s1268_s4 = smov (%p34_p1, %s32_s4), 0  ;;  %p280_p3 = pnand %p958_p0, %p279_p2 }
   0x7   : > { %p332_p4 = scmp.lt.s32.totalorder (!%p280_p3), %s1053_s26, 1  ;;  %vm425_vm0 = vcmask (!%p280_p3), 1040384   ;;  %vm426_vm1 = vcmask (!%p280_p3), 1041408   ;;  %v1063_v1 = vmov (!%p280_p3), 0   ;;  %v495_v3 = vlaneseq (!%p280_p3)  ;;  %v1025_v20 = vld [vmem:[%s1258_s1] sm:$0xff] (!%p280_p3)   ;;  %v1026_v39 = vld [vmem:[%s1258_s1 + $0x8] sm:$0xff] (!%p280_p3)  }
   0x8   : > { %283 = sbr.rel (%p280_p3) target bundleno = 502 (0x1f6), region = 44  ;;  %534 = vmatprep.mubr.bf16.mxu1 (!%p280_p3), %v1063_v1  ;;  %1023 = vset.pattern.permute.xlu0 (!%p280_p3), %v1063_v1  ;;  %v1064_v4 = vmov (!%p280_p3), 65535   ;;  %v1065_v8 = vmov (!%p280_p3), 1983009808   ;;  %v1066_v14 = vmov (!%p280_p3), 1.0   ;;  %v1067_v22 = vmov (!%p280_p3), 0.0  }
   0x9   : > { %v489_v2 = vld [vmem:[#allocation2] sm:$0x1] (!%p280_p3)  ;;  %v427_v5 = vsel (!%p280_p3), %vm425_vm0, 4294967295, %v1064_v4  ;;  %467 = vmatprep.mubr.bf16.mxu0 (!%p280_p3), %v1063_v1  ;;  %1024 = vset.pattern.permute.xlu1 (!%p280_p3), %v1063_v1  ;;  %v1141_v7 = vshrl.u32 (!%p280_p3), %v495_v3, 7  ;;  %v637_v9 = vunpack.c.l.s4 (!%p280_p3), %v1065_v8  ;;  %v691_v15 = vcombine.low (!%p280_p3), %v1066_v14, %v1066_v14 }
   0xa   : > { %492 = vperm.xlu0 (!%p280_p3), %1023, %v489_v2   ;;  %v428_v6 = vsel (!%p280_p3), %vm426_vm1, %v427_v5, 0  ;;  %vm418_vm3 = vcmask (!%p280_p3), 23552   ;;  %v488_v26 = vld [vmem:[%s1260_s3] sm:$0x1] (!%p280_p3) }
   0xb   : > { %v638_v13 = vunpack.c.0.s8 (!%p280_p3), %v637_v9  ;;  %v1150_v21 = vsub.s32 (!%p280_p3), 0, %v1141_v7  ;;  %v1155_v24 = vsub.s32 (!%p280_p3), 2, %v1141_v7  ;;  %v375_v41 = vld [vmem:[%s1259_s2] sm:$0xff] (!%p280_p3)  ;;  %vm801_vm6 = vcmp.eq.s32.totalorder (!%p280_p3), %v1141_v7, 0 }
   0xd   : > { %v1144_v19 = vsub.s32 (!%p280_p3), %v638_v13, %v1141_v7 }
   0xf   : > { %s1270_s26 = smov (!%p332_p4, %s1053_s26), 1  ;;  %v1158_v25 = vrot.slane %v691_v15, %v1144_v19 }
  0x10   : > { %s980_s29 = sshll.u32 %s1270_s26, 2  ;;  %s961_s30 = sshll.u32 %s1270_s26, 1 }
  0x11   : > { %s339_s10 = scalar_lea.vmem %s1257_s0, %s980_s29  ;;  %s348_s13 = scalar_lea.vmem %s1262_s5, %s961_s30 }
  0x12   : > { %v967_v10 = vld.sshfl [vmem:[%s339_s10] sm:$0x33 pattern:$0x76325410]  ;;  %s981_s8 = sshll.u32 %s1270_s26, 5  ;;  %s964_s15 = sshll.u32 %s1270_s26, 3 }
  0x13   : > { %v417_v11 = vcombine.high %v967_v10, %v967_v10  ;;  %v622_v12 = vld [vmem:[%s348_s13] sm:$0x3]  ;;  %v430_v16 = vand.u32 %v967_v10, %v428_v6  ;;  %s358_s11 = scalar_lea.vmem %s1263_s6, %s981_s8  ;;  %s363_s19 = scalar_lea.vmem %s1264_s7, %s964_s15 }
  0x14   : > { %v623_v17 = vunpack.c.l.bf16 %v622_v12 }
  0x15   : > { %v433_v18 = vand.u32 %v428_v6, %v417_v11 }
  0x16   : > { %vm624_vm2 = vcmp.ge.f32.partialorder %v623_v17, 0.5 }
  0x17   : > { %502 = vmatprep.subr.bf16.mxu1 %v433_v18  ;;  %435 = vmatprep.subr.bf16.mxu0 %v433_v18  ;;  %v1152_v23 = vsel %vm624_vm2, 1.0, %v1067_v22 }
  0x18   : > { %503 = vmatpush1.bf16.msra.mxu1 %v430_v16  ;;  %436 = vmatpush1.bf16.msra.mxu0 %v430_v16  ;;  %v724_v27 = vsub.f32 1.0, %v1152_v23  ;;  %v751_v28 = vmul.f32 %v1152_v23, %v1158_v25 }
  0x1a   : > { %v775_v29 = vmul.f32 %v724_v27, %v1158_v25  ;;  %v756_v30 = vrot.slane %v751_v28, %v1150_v21  ;;  %v760_v31 = vrot.slane %v751_v28, %v1155_v24  ;;  %v725_v18 = vsub.f32 0.0, %v724_v27 }
  0x1b   : > { %970 = vmatmul.mubr.msk.bf16.vlgmr.msra.gmra.mrb[0].mxu1 %vm418_vm3, %v488_v26  ;;  %968 = vmatmul.mubr.msk.bf16.vlgmr.msra.gmra.mrb[0].mxu0 %vm418_vm3, %v1025_v20  ;;  %v676_v20 = vsub.f32 0.0, %v1152_v23 }
  0x1c   : > { %477 = vmatprep.mubr.bf16.mxu0 %v1063_v1  ;;  %v780_v32 = vrot.slane %v775_v29, %v1150_v21  ;;  %v784_v33 = vrot.slane %v775_v29, %v1155_v24  ;;  %v763_v34 = vsel %vm425_vm0, %v756_v30, 0.0  ;;  %v764_v35 = vsel %vm425_vm0, %v760_v31, 0.0 }
  0x1d   : > { %v765_v36 = vadd.f32 %v764_v35, %v763_v34 }
  0x1e   : > { %v787_v37 = vsel %vm425_vm0, %v780_v32, 0.0  ;;  %v788_v38 = vsel %vm425_vm0, %v784_v33, 0.0 }
  0x1f   : > { %766 = vadd.xlane.f32.xlu1 %v765_v36  ;;  %v789_v40 = vadd.f32 %v788_v38, %v787_v37 }
  0x23   : > { %969 = vmatmul.mubr.msk.bf16.gmra.mrb[4].mxu0 %vm418_vm3, %v1026_v39  ;;  %790 = vadd.xlane.f32.xlu1 %v789_v40  ;;  %v378_v40 = vld [vmem:[%s1259_s2 + $0x18] sm:$0xff] }
  0x34   : > { %381 = vperm.xlu1 %1024, %v375_v41  }
  0x89   : > { %v493_v42 = vpop.permute.xlu0 %492 }
  0x8a   : > { %v498_v43 = vrot.slane %v493_v42, %v1150_v21 }
  0xee   : > { %v536_v44 = vpop.f32.mrb[0].mxu1  ;;  %v1187_v45 = vpop.f32.mrb[0].mxu0 }
  0xef   : > { %v537_v46 = vadd.f32 %v536_v44, %v498_v43  ;;  %v538_v47 = vpop.f32.mrb[1].mxu1  ;;  %v1189_v48 = vpop.f32.mrb[1].mxu0 }
  0xf0   : > { %v539_v49 = vadd.f32 %v538_v47, %v498_v43  ;;  %v540_v50 = vpop.f32.mrb[2].mxu1  ;;  %v473_v38 = vpop.f32.mrb[2].mxu0 }
  0xf1   : > { %vm627_vm4 = vcmp.ge.f32.partialorder %v537_v46, 0.0  ;;  %v658_v51 = vmul.f32 2.0, %v537_v46  ;;  %v541_v52 = vpop.f32.mrb[3].mxu1  ;;  %v767_v44 = vpop.xlane.xlu1 %766 }
  0xf2   : > { %v976_v53 = vsel %vm627_vm4, 1.0, %v1067_v22  ;;  %vm628_vm5 = vcmp.ge.f32.partialorder %v539_v49, 0.0  ;;  %v659_v54 = vmul.f32 2.0, %v539_v49  ;;  %v768_v47 = vrot.slane %v767_v44, 4 }
  0xf3   : > { %v660_v55 = vmul.f32 %v976_v53, %v658_v51  ;;  %v977_v56 = vsel %vm628_vm5, 1.0, %v1067_v22 }
  0xf4   : > { %v635_v57 = vcombine.low %v976_v53, %v977_v56  ;;  %v661_v58 = vmul.f32 %v977_v56, %v659_v54  ;;  %v769_v50 = vadd.f32 %v768_v47, %v767_v44 }
  0xf5   : > { %v662_v59 = vsub.f32 %v537_v46, %v660_v55 }
  0xf6   : > { %v642_v60 = vrot.slane %v635_v57, %v1144_v19  ;;  %v663_v61 = vsub.f32 %v539_v49, %v661_v58  ;;  %v770_v53 = vrot.slane %v769_v50, 2 }
  0xf7   : > { %v664_v62 = vmul.f32 1.442695, %v662_v59 }
  0xf8   : > { %v644_v63 = vsub.f32 %v1152_v23, %v642_v60  ;;  %v666_v0 = vmul.f32 1.442695, %v663_v61 }
  0xf9   : > { %1027 = vpow2.f32 %v664_v62 }
  0xfa   : > { %v649_v1 = vrot.slane %v644_v63, %v1150_v21  ;;  %v653_v2 = vrot.slane %v644_v63, %v1155_v24  ;;  %1029 = vpow2.f32 %v666_v0  ;;  %v771_v0 = vadd.f32 %v770_v53, %v769_v50 }
  0xfc   : > { %v657_v4 = vmul.f32 %v653_v2, %v539_v49  ;;  %v656_v5 = vmul.f32 %v649_v1, %v537_v46  ;;  %v791_v46 = vpop.xlane.xlu1 %790 }
  0xfd   : > { %v792_v49 = vrot.slane %v791_v46, 4 }
  0xff   : > { %v793_v52 = vadd.f32 %v792_v49, %v791_v46 }
 0x100   : > { %v382_v51 = vpop.permute.xlu1 %381 }
 0x101   : > { %v794_v58 = vrot.slane %v793_v52, 2  ;;  %v1219_v59 = vadd.f32 %v1187_v45, %v382_v51  ;;  %v1222_v60 = vadd.f32 %v1189_v48, %v382_v51 }
 0x103   : > { %v1028_v6 = vpop.eup %1027 }
 0x104   : > { %v1030_v8 = vpop.eup %1029  ;;  %v668_v9 = vadd.f32 1.0, %v1028_v6  ;;  %v543_v6 = vmul.f32 %v1219_v59, %v1219_v59 }
 0x105   : > { %v669_v10 = vadd.f32 1.0, %v1030_v8  ;;  %v544_v8 = vmul.f32 %v1222_v60, %v1222_v60 }
 0x106   : > { %1031 = vlog2.f32 %v668_v9  ;;  %v795_v9 = vadd.f32 %v794_v58, %v793_v52 }
 0x107   : > { %1033 = vlog2.f32 %v669_v10 }
 0x110   : > { %v1032_v11 = vpop.eup %1031 }
 0x111   : > { %v1034_v12 = vpop.eup %1033  ;;  %v671_v13 = vmul.f32 0.6931472, %v1032_v11 }
 0x112   : > { %v673_v14 = vmul.f32 0.6931472, %v1034_v12 }
 0x113   : > { %v674_v15 = vsub.f32 %v656_v5, %v671_v13 }
 0x114   : > { %v675_v16 = vsub.f32 %v657_v4, %v673_v14  ;;  %v772_v14 = vrot.slane %v771_v0, 1 }
 0x116   : > { %v679_v17 = vcombine.low %v674_v15, %v675_v16 }
 0x118   : > { %v686_v22 = vrot.slane %v679_v17, %v1144_v19 }
 0x11a   : > { %v726_v26 = vmul.f32 %v725_v18, %v686_v22  ;;  %v688_v28 = vmul.f32 %v686_v22, %v676_v20 }
 0x11c   : > { %v727_v29 = vmul.f32 %v726_v26, %v1158_v25  ;;  %v700_v30 = vmul.f32 %v1158_v25, %v688_v28  ;;  %v376_v25 = vld [vmem:[%s1259_s2 + $0x8] sm:$0xff] }
 0x11e   : > { %v732_v31 = vrot.slane %v727_v29, %v1150_v21  ;;  %v736_v32 = vrot.slane %v727_v29, %v1155_v24  ;;  %v705_v33 = vrot.slane %v700_v30, %v1150_v21  ;;  %v709_v34 = vrot.slane %v700_v30, %v1155_v24  ;;  %v475_v21 = vpop.f32.mrb[3].mxu0  ;;  %v377_v24 = vld [vmem:[%s1259_s2 + $0x10] sm:$0xff] }
 0x11f   : > { %v479_v39 = vpop.f32.mrb[4].mxu0 }
 0x120   : > { %v739_v27 = vsel %vm425_vm0, %v732_v31, 0.0  ;;  %v740_v23 = vsel %vm425_vm0, %v736_v32, 0.0  ;;  %v712_v19 = vsel %vm425_vm0, %v705_v33, 0.0  ;;  %v713_v35 = vsel %vm425_vm0, %v709_v34, 0.0  ;;  %v481_v41 = vpop.f32.mrb[5].mxu0 }
 0x121   : > { %v741_v36 = vadd.f32 %v740_v23, %v739_v27  ;;  %v714_v37 = vadd.f32 %v713_v35, %v712_v19  ;;  %v483_v42 = vpop.f32.mrb[6].mxu0  ;;  %v796_v31 = vrot.slane %v795_v9, 1  ;;  %v773_v35 = vadd.f32 %v772_v14, %v771_v0 }
 0x122   : > { %v485_v43 = vpop.f32.mrb[7].mxu0 }
 0x123   : > { %742 = vadd.xlane.f32.xlu1 %v741_v36  ;;  %715 = vadd.xlane.f32.xlu0 %v714_v37 }
 0x134   : > { %386 = vperm.xlu1 %1024, %v376_v25   ;;  %v797_v25 = vadd.f32 %v796_v31, %v795_v9 }
 0x138   : > { %391 = vperm.xlu1 %1024, %v377_v24  }
 0x139   : > { %396 = vperm.xlu0 %1023, %v378_v40  }
 0x1b0   : > { %v743_v54 = vpop.xlane.xlu1 %742  ;;  %v716_v55 = vpop.xlane.xlu0 %715 }
 0x1b1   : > { %v744_v56 = vrot.slane %v743_v54, 4  ;;  %v717_v57 = vrot.slane %v716_v55, 4 }
 0x1b3   : > { %v745_v61 = vadd.f32 %v744_v56, %v743_v54  ;;  %v718_v62 = vadd.f32 %v717_v57, %v716_v55 }
 0x1b4   : > { %v387_v63 = vpop.permute.xlu1 %386 }
 0x1b5   : > { %v746_v1 = vrot.slane %v745_v61, 2  ;;  %v719_v2 = vrot.slane %v718_v62, 2  ;;  %v474_v4 = vadd.f32 %v473_v38, %v387_v63  ;;  %v476_v5 = vadd.f32 %v475_v21, %v387_v63 }
 0x1b7   : > { %v545_v45 = vmul.f32 %v474_v4, %v474_v4  ;;  %v546_v10 = vmul.f32 %v476_v5, %v476_v5  ;;  %v720_v11 = vadd.f32 %v719_v2, %v718_v62  ;;  %v747_v48 = vadd.f32 %v746_v1, %v745_v61 }
 0x1b8   : > { %v392_v12 = vpop.permute.xlu1 %391  ;;  %v397_v13 = vpop.permute.xlu0 %396 }
 0x1b9   : > { %v551_v15 = vadd.f32 %v545_v45, %v543_v6  ;;  %v560_v16 = vadd.f32 %v546_v10, %v544_v8  ;;  %v480_v17 = vadd.f32 %v479_v39, %v392_v12  ;;  %v482_v18 = vadd.f32 %v481_v41, %v392_v12 }
 0x1ba   : > { %v484_v20 = vadd.f32 %v483_v42, %v397_v13  ;;  %v486_v22 = vadd.f32 %v485_v43, %v397_v13  ;;  %v721_v26 = vrot.slane %v720_v11, 1  ;;  %v748_v28 = vrot.slane %v747_v48, 1 }
 0x1bb   : > { %v547_v29 = vmul.f32 %v480_v17, %v480_v17  ;;  %v548_v30 = vmul.f32 %v482_v18, %v482_v18 }
 0x1bc   : > { %v722_v32 = vadd.f32 %v721_v26, %v720_v11  ;;  %v749_v33 = vadd.f32 %v748_v28, %v747_v48  ;;  %v549_v23 = vmul.f32 %v484_v20, %v484_v20  ;;  %v550_v19 = vmul.f32 %v486_v22, %v486_v22 }
 0x1bd   : > { %v552_v34 = vadd.f32 %v551_v15, %v547_v29  ;;  %v561_v27 = vadd.f32 %v560_v16, %v548_v30 }
 0x1be   : > { %986 = vpush %v722_v32 }
 0x1bf   : > { %v553_v36 = vadd.f32 %v552_v34, %v549_v23  ;;  %v562_v37 = vadd.f32 %v561_v27, %v550_v19  ;;  %988 = vpush %v749_v33 }
 0x1c0   : > { %990 = vpush %v773_v35 }
 0x1c1   : > { %v554_v38 = vrot.slane %v553_v36, 4  ;;  %v563_v21 = vrot.slane %v562_v37, 4  ;;  %992 = vpush %v797_v25 }
 0x1c3   : > { %v555_v24 = vadd.f32 %v554_v38, %v553_v36  ;;  %v564_v39 = vadd.f32 %v563_v21, %v562_v37 }
 0x1c5   : > { %v556_v40 = vrot.slane %v555_v24, 2  ;;  %v565_v41 = vrot.slane %v564_v39, 2 }
 0x1c7   : > { %v557_v42 = vadd.f32 %v556_v40, %v555_v24  ;;  %v566_v43 = vadd.f32 %v565_v41, %v564_v39 }
 0x1c9   : > { %v558_v44 = vrot.slane %v557_v42, 1  ;;  %v567_v46 = vrot.slane %v566_v43, 1 }
 0x1cb   : > { %v559_v47 = vadd.f32 %v558_v44, %v557_v42  ;;  %v568_v49 = vadd.f32 %v567_v46, %v566_v43 }
 0x1cd   : > { %v569_v50 = vmax.f32 %v559_v47, 1e-24  ;;  %v570_v51 = vmax.f32 %v568_v49, 1e-24 }
 0x1cf   : > { %1035 = vrsqrt.f32 %v569_v50 }
 0x1d0   : > { %1037 = vrsqrt.f32 %v570_v51 }
 0x1d9   : > { %v1036_v52 = vpop.eup %1035 }
 0x1da   : > { %v1038_v53 = vpop.eup %1037  ;;  %v579_v54 = vmul.f32 %v1036_v52, %v484_v20  ;;  %v573_v55 = vmul.f32 %v1036_v52, %v1219_v59  ;;  %v575_v56 = vmul.f32 %v1036_v52, %v474_v4  ;;  %v577_v57 = vmul.f32 %v1036_v52, %v480_v17 }
 0x1db   : > { %v574_v58 = vmul.f32 %v1038_v53, %v1222_v60  ;;  %v576_v61 = vmul.f32 %v1038_v53, %v476_v5  ;;  %v578_v62 = vmul.f32 %v1038_v53, %v482_v18  ;;  %v580_v63 = vmul.f32 %v1038_v53, %v486_v22 }
 0x1dc   : > { %v610_v59 = vand.u32 127, %v495_v3 }
 0x1dd   : > { %v982_v0 = vpack.c.bf16 %v574_v58, %v573_v55  ;;  %v983_v1 = vpack.c.bf16 %v576_v61, %v575_v56  ;;  %v984_v2 = vpack.c.bf16 %v578_v62, %v577_v57  ;;  %v985_v6 = vpack.c.bf16 %v580_v63, %v579_v54 }
 0x1de   : > { %vm802_vm7 = vcmp.eq.s32.totalorder %v610_v59, 0  ;;  %vm806_vm8 = vcmp.eq.s32.totalorder %v610_v59, 1  ;;  %vm810_vm9 = vcmp.eq.s32.totalorder %v610_v59, 2  ;;  %vm814_vm11 = vcmp.eq.s32.totalorder %v610_v59, 3 }
 0x1df   : > { %605 = vst [vmem:[%s358_s11] sm:$0xff] %v982_v0  ;;  %606 = vst [vmem:[%s358_s11 + $0x8] sm:$0xff] %v983_v1 }
 0x1e0   : > { %607 = vst [vmem:[%s358_s11 + $0x10] sm:$0xff] %v984_v2  ;;  %608 = vst [vmem:[%s358_s11 + $0x18] sm:$0xff] %v985_v6 }
 0x1e1   : > { %vm803_vm10 = vmand %vm801_vm6, %vm802_vm7 }
 0x1e2   : > { %vm807_vm12 = vmand %vm801_vm6, %vm806_vm8 }
 0x1e3   : > { %vm811_vm13 = vmand %vm801_vm6, %vm810_vm9 }
 0x1e4   : > { %vm815_vm14 = vmand %vm801_vm6, %vm814_vm11 }
 0x1ef   : > { %s987_s12 = spop %986 }
 0x1f0   : > { %v804_v60 = vstv %s987_s12  ;;  %s989_s13 = spop %988 }
 0x1f1   : > { %v805_v4 = vsel %vm803_vm10, %v804_v60, 0.0  ;;  %v808_v3 = vstv %s989_s13  ;;  %s991_s14 = spop %990 }
 0x1f2   : > { %v809_v5 = vsel %vm807_vm12, %v808_v3, %v805_v4  ;;  %v812_v8 = vstv %s991_s14  ;;  %s993_s16 = spop %992 }
 0x1f3   : > { %v813_v9 = vsel %vm811_vm13, %v812_v8, %v809_v5  ;;  %v816_v45 = vstv %s993_s16 }
 0x1f4   : > { %v817_v10 = vsel %vm815_vm14, %v816_v45, %v813_v9 }
 0x1f5   : > { %820 = vst [vmem:[%s363_s19] sm:$0xff] %v817_v10 }
 0x1f6 PF: > { %s20_s28 = sadd.s32 1, %s1061_s28   ;;  %s1265_s26 = smov %s1057_s27 }
 0x1f7   : > { %p17_p5 = scmp.ge.s32.totalorder %s20_s28, 4   ;;  %s1266_s27 = smov %s1268_s4 }
 0x1f9   :  { %19 = sbr.rel (!%p17_p5) target bundleno = 3 (0x3), region = 93 }

// kernel: contrastive_forward.5
= control target key start
LH: loop header
LB: loop body
LE: loop exit
PB: predicated region body
PF: predicated region fallthrough
CT: control target
= control target key end

     0   :  { %vm251_vm0 = vcmask 261120   ;;  %s2410_s1 = inlined_call_operand.vmem [shape: f32[32,128], index: 1, kind: input, shape index: {}]   ;;  %s2411_s2 = inlined_call_operand.vmem [shape: f32[32,128], index: 2, kind: input, shape index: {}]   ;;  %s2412_s0 = inlined_call_operand.vmem [shape: bf16[512,32], index: 0, kind: input, shape index: {}]   ;;  %s2413_s3 = inlined_call_operand.vmem [shape: f32[512,128], index: 3, kind: output, shape index: {0}]   ;;  %s2414_s4 = inlined_call_operand.vmem [shape: f32[512,128], index: 4, kind: output, shape index: {1}]  }
   0x1   :  { %v85_v0 = vld [vmem:[%s2410_s1] sm:$0xff]  ;;  %v86_v1 = vld [vmem:[%s2410_s1 + $0x8] sm:$0xff]  ;;  %v87_v5 = vld [vmem:[%s2410_s1 + $0x10] sm:$0xff] }
   0x2   :  { %v765_v2 = vld [vmem:[%s2411_s2] sm:$0xff]  ;;  %v89_v3 = vpack.c.bf16 %v86_v1, %v85_v0  ;;  %v766_v4 = vld [vmem:[%s2411_s2 + $0x8] sm:$0xff]  ;;  %v88_v6 = vld [vmem:[%s2410_s1 + $0x18] sm:$0xff] }
   0x3   :  { %v769_v7 = vpack.c.bf16 %v766_v4, %v765_v2  ;;  %v90_v8 = vpack.c.bf16 %v88_v6, %v87_v5  ;;  %v767_v9 = vld [vmem:[%s2411_s2 + $0x10] sm:$0xff]  ;;  %v768_v10 = vld [vmem:[%s2411_s2 + $0x18] sm:$0xff]  ;;  %v1785_v12 = vld [vmem:[%s2412_s0] sm:$0xff]  }
   0x4   :  { %1649 = vmatprep.subr.bf16.mxu0 %v89_v3  ;;  %v770_v11 = vpack.c.bf16 %v768_v10, %v767_v9  ;;  %1653 = vmatprep.mubr.msk.bf16.mxu0 %vm251_vm0, %v1785_v12  ;;  %v1786_v13 = vld [vmem:[%s2412_s0 + $0x8] sm:$0xff]   ;;  %v1787_v14 = vld [vmem:[%s2412_s0 + $0x10] sm:$0xff]   ;;  %v1788_v15 = vld [vmem:[%s2412_s0 + $0x18] sm:$0xff]  }
   0x5   :  { %1717 = vmatprep.subr.bf16.mxu1 %v769_v7  ;;  %1650 = vmatpush3.bf16.msra.mxu0 %v89_v3  ;;  %v1789_v16 = vld [vmem:[%s2412_s0 + $0x20] sm:$0xff]   ;;  %v1790_v17 = vld [vmem:[%s2412_s0 + $0x28] sm:$0xff]   ;;  %v1791_v18 = vld [vmem:[%s2412_s0 + $0x30] sm:$0xff]  }
   0x6   :  { %1718 = vmatpush3.bf16.msra.mxu1 %v769_v7  ;;  %1651 = vmatprep.subr.bf16.mxu0 %v90_v8  ;;  %v1792_v19 = vld [vmem:[%s2412_s0 + $0x38] sm:$0xff]   ;;  %v1793_v20 = vld [vmem:[%s2412_s0 + $0x40] sm:$0xff]   ;;  %v1794_v21 = vld [vmem:[%s2412_s0 + $0x48] sm:$0xff]  }
   0x7   :  { %1719 = vmatprep.subr.bf16.mxu1 %v770_v11  ;;  %1721 = vmatprep.mubr.msk.bf16.mxu1 %vm251_vm0, %v1785_v12  ;;  %v1795_v22 = vld [vmem:[%s2412_s0 + $0x50] sm:$0xff]   ;;  %v1796_v23 = vld [vmem:[%s2412_s0 + $0x58] sm:$0xff]   ;;  %v1797_v24 = vld [vmem:[%s2412_s0 + $0x60] sm:$0xff]  }
   0x8   :  { %v1798_v25 = vld [vmem:[%s2412_s0 + $0x68] sm:$0xff]   ;;  %v1799_v26 = vld [vmem:[%s2412_s0 + $0x70] sm:$0xff]   ;;  %v1800_v27 = vld [vmem:[%s2412_s0 + $0x78] sm:$0xff]  }
   0x9   :  { %1652 = vmatpush3.bf16.msra.mxu0 %v90_v8  ;;  %v1801_v28 = vld [vmem:[%s2412_s0 + $0x80] sm:$0xff]   ;;  %v1802_v29 = vld [vmem:[%s2412_s0 + $0x88] sm:$0xff]   ;;  %v1803_v30 = vld [vmem:[%s2412_s0 + $0x90] sm:$0xff]  }
   0xa   :  { %1720 = vmatpush3.bf16.msra.mxu1 %v770_v11  ;;  %v1804_v31 = vld [vmem:[%s2412_s0 + $0x98] sm:$0xff]   ;;  %v1805_v32 = vld [vmem:[%s2412_s0 + $0xa0] sm:$0xff]   ;;  %v1806_v33 = vld [vmem:[%s2412_s0 + $0xa8] sm:$0xff]  }
   0xb   :  { %v1807_v34 = vld [vmem:[%s2412_s0 + $0xb0] sm:$0xff]   ;;  %v1808_v35 = vld [vmem:[%s2412_s0 + $0xb8] sm:$0xff]   ;;  %v1809_v36 = vld [vmem:[%s2412_s0 + $0xc0] sm:$0xff]  }
   0xc   :  { %1654 = vmatmul.mubr.msk.bf16.vlgmr.msra.gmra.mrb[0].mxu0 %vm251_vm0, %v1786_v13  ;;  %v1810_v37 = vld [vmem:[%s2412_s0 + $0xc8] sm:$0xff]   ;;  %v1811_v38 = vld [vmem:[%s2412_s0 + $0xd0] sm:$0xff]   ;;  %v1812_v39 = vld [vmem:[%s2412_s0 + $0xd8] sm:$0xff]  }
   0xd   :  { %1722 = vmatmul.mubr.msk.bf16.vlgmr.msra.gmra.mrb[0].mxu1 %vm251_vm0, %v1786_v13  ;;  %1657 = vmatprep.mubr.msk.bf16.mxu0 %vm251_vm0, %v1787_v14  ;;  %v1813_v40 = vld [vmem:[%s2412_s0 + $0xe0] sm:$0xff]   ;;  %v1814_v41 = vld [vmem:[%s2412_s0 + $0xe8] sm:$0xff]   ;;  %v1815_v42 = vld [vmem:[%s2412_s0 + $0xf0] sm:$0xff]  }
   0xe   :  { %1725 = vmatprep.mubr.msk.bf16.mxu1 %vm251_vm0, %v1787_v14  ;;  %v1816_v43 = vld [vmem:[%s2412_s0 + $0xf8] sm:$0xff]  }
  0x14   :  { %1658 = vmatmul.mubr.msk.bf16.gmra.mrb[4].mxu0 %vm251_vm0, %v1788_v15 }
  0x15   :  { %1726 = vmatmul.mubr.msk.bf16.gmra.mrb[4].mxu1 %vm251_vm0, %v1788_v15  ;;  %1661 = vmatprep.mubr.msk.bf16.mxu0 %vm251_vm0, %v1789_v16 }
  0x16   :  { %1729 = vmatprep.mubr.msk.bf16.mxu1 %vm251_vm0, %v1789_v16 }
  0x1c   :  { %1662 = vmatmul.mubr.msk.bf16.gmra.mrb[8].mxu0 %vm251_vm0, %v1790_v17 }
  0x1d   :  { %1730 = vmatmul.mubr.msk.bf16.gmra.mrb[8].mxu1 %vm251_vm0, %v1790_v17  ;;  %1665 = vmatprep.mubr.msk.bf16.mxu0 %vm251_vm0, %v1791_v18 }
  0x1e   :  { %1733 = vmatprep.mubr.msk.bf16.mxu1 %vm251_vm0, %v1791_v18 }
  0x24   :  { %1666 = vmatmul.mubr.msk.bf16.gmra.mrb[12].mxu0 %vm251_vm0, %v1792_v19 }
  0x25   :  { %1734 = vmatmul.mubr.msk.bf16.gmra.mrb[12].mxu1 %vm251_vm0, %v1792_v19  ;;  %1669 = vmatprep.mubr.msk.bf16.mxu0 %vm251_vm0, %v1793_v20 }
  0x26   :  { %1737 = vmatprep.mubr.msk.bf16.mxu1 %vm251_vm0, %v1793_v20 }
  0x2c   :  { %1670 = vmatmul.mubr.msk.bf16.gmra.mrb[16].mxu0 %vm251_vm0, %v1794_v21 }
  0x2d   :  { %1738 = vmatmul.mubr.msk.bf16.gmra.mrb[16].mxu1 %vm251_vm0, %v1794_v21  ;;  %1673 = vmatprep.mubr.msk.bf16.mxu0 %vm251_vm0, %v1795_v22 }
  0x2e   :  { %1741 = vmatprep.mubr.msk.bf16.mxu1 %vm251_vm0, %v1795_v22 }
  0x34   :  { %1674 = vmatmul.mubr.msk.bf16.gmra.mrb[20].mxu0 %vm251_vm0, %v1796_v23 }
  0x35   :  { %1742 = vmatmul.mubr.msk.bf16.gmra.mrb[20].mxu1 %vm251_vm0, %v1796_v23  ;;  %1677 = vmatprep.mubr.msk.bf16.mxu0 %vm251_vm0, %v1797_v24 }
  0x36   :  { %1745 = vmatprep.mubr.msk.bf16.mxu1 %vm251_vm0, %v1797_v24 }
  0x3c   :  { %1678 = vmatmul.mubr.msk.bf16.gmra.mrb[24].mxu0 %vm251_vm0, %v1798_v25 }
  0x3d   :  { %1746 = vmatmul.mubr.msk.bf16.gmra.mrb[24].mxu1 %vm251_vm0, %v1798_v25  ;;  %1681 = vmatprep.mubr.msk.bf16.mxu0 %vm251_vm0, %v1799_v26 }
  0x3e   :  { %1749 = vmatprep.mubr.msk.bf16.mxu1 %vm251_vm0, %v1799_v26 }
  0x44   :  { %1682 = vmatmul.mubr.msk.bf16.gmra.mrb[28].mxu0 %vm251_vm0, %v1800_v27 }
  0x45   :  { %1750 = vmatmul.mubr.msk.bf16.gmra.mrb[28].mxu1 %vm251_vm0, %v1800_v27  ;;  %1685 = vmatprep.mubr.msk.bf16.mxu0 %vm251_vm0, %v1801_v28 }
  0x46   :  { %1753 = vmatprep.mubr.msk.bf16.mxu1 %vm251_vm0, %v1801_v28 }
  0x4c   :  { %1686 = vmatmul.mubr.msk.bf16.gmra.mrb[32].mxu0 %vm251_vm0, %v1802_v29 }
  0x4d   :  { %1754 = vmatmul.mubr.msk.bf16.gmra.mrb[32].mxu1 %vm251_vm0, %v1802_v29  ;;  %1689 = vmatprep.mubr.msk.bf16.mxu0 %vm251_vm0, %v1803_v30 }
  0x4e   :  { %1757 = vmatprep.mubr.msk.bf16.mxu1 %vm251_vm0, %v1803_v30 }
  0x54   :  { %1690 = vmatmul.mubr.msk.bf16.gmra.mrb[36].mxu0 %vm251_vm0, %v1804_v31 }
  0x55   :  { %1758 = vmatmul.mubr.msk.bf16.gmra.mrb[36].mxu1 %vm251_vm0, %v1804_v31  ;;  %1693 = vmatprep.mubr.msk.bf16.mxu0 %vm251_vm0, %v1805_v32 }
  0x56   :  { %1761 = vmatprep.mubr.msk.bf16.mxu1 %vm251_vm0, %v1805_v32 }
  0x5c   :  { %1694 = vmatmul.mubr.msk.bf16.gmra.mrb[40].mxu0 %vm251_vm0, %v1806_v33 }
  0x5d   :  { %1762 = vmatmul.mubr.msk.bf16.gmra.mrb[40].mxu1 %vm251_vm0, %v1806_v33  ;;  %1697 = vmatprep.mubr.msk.bf16.mxu0 %vm251_vm0, %v1807_v34 }
  0x5e   :  { %1765 = vmatprep.mubr.msk.bf16.mxu1 %vm251_vm0, %v1807_v34 }
  0x64   :  { %1698 = vmatmul.mubr.msk.bf16.gmra.mrb[44].mxu0 %vm251_vm0, %v1808_v35 }
  0x65   :  { %1766 = vmatmul.mubr.msk.bf16.gmra.mrb[44].mxu1 %vm251_vm0, %v1808_v35  ;;  %1701 = vmatprep.mubr.msk.bf16.mxu0 %vm251_vm0, %v1809_v36 }
  0x66   :  { %1769 = vmatprep.mubr.msk.bf16.mxu1 %vm251_vm0, %v1809_v36 }
  0x6c   :  { %1702 = vmatmul.mubr.msk.bf16.gmra.mrb[48].mxu0 %vm251_vm0, %v1810_v37 }
  0x6d   :  { %1770 = vmatmul.mubr.msk.bf16.gmra.mrb[48].mxu1 %vm251_vm0, %v1810_v37  ;;  %1705 = vmatprep.mubr.msk.bf16.mxu0 %vm251_vm0, %v1811_v38 }
  0x6e   :  { %1773 = vmatprep.mubr.msk.bf16.mxu1 %vm251_vm0, %v1811_v38 }
  0x74   :  { %1706 = vmatmul.mubr.msk.bf16.gmra.mrb[52].mxu0 %vm251_vm0, %v1812_v39 }
  0x75   :  { %1774 = vmatmul.mubr.msk.bf16.gmra.mrb[52].mxu1 %vm251_vm0, %v1812_v39  ;;  %1709 = vmatprep.mubr.msk.bf16.mxu0 %vm251_vm0, %v1813_v40 }
  0x76   :  { %1777 = vmatprep.mubr.msk.bf16.mxu1 %vm251_vm0, %v1813_v40 }
  0x7c   :  { %1710 = vmatmul.mubr.msk.bf16.gmra.mrb[56].mxu0 %vm251_vm0, %v1814_v41 }
  0x7d   :  { %1778 = vmatmul.mubr.msk.bf16.gmra.mrb[56].mxu1 %vm251_vm0, %v1814_v41  ;;  %1713 = vmatprep.mubr.msk.bf16.mxu0 %vm251_vm0, %v1815_v42 }
  0x7e   :  { %1781 = vmatprep.mubr.msk.bf16.mxu1 %vm251_vm0, %v1815_v42 }
  0x84   :  { %1714 = vmatmul.mubr.msk.bf16.gmra.mrb[60].mxu0 %vm251_vm0, %v1816_v43 }
  0x85   :  { %1782 = vmatmul.mubr.msk.bf16.gmra.mrb[60].mxu1 %vm251_vm0, %v1816_v43 }
  0xdf   :  { %v1655_v44 = vpop.f32.mrb[0].mxu0 }
  0xe0   :  { %v639_v45 = vmul.f32 14.285714, %v1655_v44  ;;  %v1723_v46 = vpop.f32.mrb[0].mxu1  ;;  %v382_v47 = vpop.f32.mrb[1].mxu0 }
  0xe1   :  { %v1319_v48 = vmul.f32 14.285714, %v1723_v46  ;;  %v637_v49 = vmul.f32 14.285714, %v382_v47  ;;  %v1062_v50 = vpop.f32.mrb[1].mxu1  ;;  %v1656_v51 = vpop.f32.mrb[2].mxu0 }
  0xe2   :  { %703 = vst [vmem:[%s2413_s3 + $0x10] sm:$0xff] %v639_v45  ;;  %v1317_v52 = vmul.f32 14.285714, %v1062_v50  ;;  %v640_v53 = vmul.f32 14.285714, %v1656_v51  ;;  %v1724_v54 = vpop.f32.mrb[2].mxu1 }
  0xe3   :  { %v385_v55 = vpop.f32.mrb[3].mxu0  ;;  %1383 = vst [vmem:[%s2414_s4 + $0x10] sm:$0xff] %v1319_v48  ;;  %701 = vst [vmem:[%s2413_s3] sm:$0xff] %v637_v49  ;;  %v1320_v56 = vmul.f32 14.285714, %v1724_v54  ;;  %v1065_v58 = vpop.f32.mrb[3].mxu1 }
  0xe4   :  { %v638_v57 = vmul.f32 14.285714, %v385_v55  ;;  %1381 = vst [vmem:[%s2414_s4] sm:$0xff] %v1317_v52  ;;  %704 = vst [vmem:[%s2413_s3 + $0x18] sm:$0xff] %v640_v53  ;;  %v1318_v59 = vmul.f32 14.285714, %v1065_v58 }
  0xe5   :  { %1384 = vst [vmem:[%s2414_s4 + $0x18] sm:$0xff] %v1320_v56 }
  0xe6   :  { %702 = vst [vmem:[%s2413_s3 + $0x8] sm:$0xff] %v638_v57  ;;  %1382 = vst [vmem:[%s2414_s4 + $0x8] sm:$0xff] %v1318_v59 }
  0xe7   :  { %v1659_v60 = vpop.f32.mrb[4].mxu0 }
  0xe8   :  { %v643_v61 = vmul.f32 14.285714, %v1659_v60  ;;  %v1727_v62 = vpop.f32.mrb[4].mxu1  ;;  %v398_v63 = vpop.f32.mrb[5].mxu0 }
  0xe9   :  { %v1323_v0 = vmul.f32 14.285714, %v1727_v62  ;;  %v641_v1 = vmul.f32 14.285714, %v398_v63  ;;  %v1078_v2 = vpop.f32.mrb[5].mxu1  ;;  %v1660_v3 = vpop.f32.mrb[6].mxu0 }
  0xea   :  { %707 = vst [vmem:[%s2413_s3 + $0x30] sm:$0xff] %v643_v61  ;;  %v1321_v4 = vmul.f32 14.285714, %v1078_v2  ;;  %v644_v5 = vmul.f32 14.285714, %v1660_v3  ;;  %v1728_v6 = vpop.f32.mrb[6].mxu1 }
  0xeb   :  { %v401_v7 = vpop.f32.mrb[7].mxu0  ;;  %1387 = vst [vmem:[%s2414_s4 + $0x30] sm:$0xff] %v1323_v0  ;;  %705 = vst [vmem:[%s2413_s3 + $0x20] sm:$0xff] %v641_v1  ;;  %v1324_v8 = vmul.f32 14.285714, %v1728_v6  ;;  %v1081_v10 = vpop.f32.mrb[7].mxu1 }
  0xec   :  { %v642_v9 = vmul.f32 14.285714, %v401_v7  ;;  %1385 = vst [vmem:[%s2414_s4 + $0x20] sm:$0xff] %v1321_v4  ;;  %708 = vst [vmem:[%s2413_s3 + $0x38] sm:$0xff] %v644_v5  ;;  %v1322_v11 = vmul.f32 14.285714, %v1081_v10 }
  0xed   :  { %1388 = vst [vmem:[%s2414_s4 + $0x38] sm:$0xff] %v1324_v8 }
  0xee   :  { %706 = vst [vmem:[%s2413_s3 + $0x28] sm:$0xff] %v642_v9  ;;  %1386 = vst [vmem:[%s2414_s4 + $0x28] sm:$0xff] %v1322_v11 }
  0xef   :  { %v1663_v12 = vpop.f32.mrb[8].mxu0 }
  0xf0   :  { %v647_v13 = vmul.f32 14.285714, %v1663_v12  ;;  %v1731_v14 = vpop.f32.mrb[8].mxu1  ;;  %v414_v15 = vpop.f32.mrb[9].mxu0 }
  0xf1   :  { %v1327_v16 = vmul.f32 14.285714, %v1731_v14  ;;  %v645_v17 = vmul.f32 14.285714, %v414_v15  ;;  %v1094_v18 = vpop.f32.mrb[9].mxu1  ;;  %v1664_v19 = vpop.f32.mrb[10].mxu0 }
  0xf2   :  { %711 = vst [vmem:[%s2413_s3 + $0x50] sm:$0xff] %v647_v13  ;;  %v1325_v20 = vmul.f32 14.285714, %v1094_v18  ;;  %v648_v21 = vmul.f32 14.285714, %v1664_v19  ;;  %v1732_v22 = vpop.f32.mrb[10].mxu1 }
  0xf3   :  { %v417_v23 = vpop.f32.mrb[11].mxu0  ;;  %1391 = vst [vmem:[%s2414_s4 + $0x50] sm:$0xff] %v1327_v16  ;;  %709 = vst [vmem:[%s2413_s3 + $0x40] sm:$0xff] %v645_v17  ;;  %v1328_v24 = vmul.f32 14.285714, %v1732_v22  ;;  %v1097_v26 = vpop.f32.mrb[11].mxu1 }
  0xf4   :  { %v646_v25 = vmul.f32 14.285714, %v417_v23  ;;  %1389 = vst [vmem:[%s2414_s4 + $0x40] sm:$0xff] %v1325_v20  ;;  %712 = vst [vmem:[%s2413_s3 + $0x58] sm:$0xff] %v648_v21  ;;  %v1326_v27 = vmul.f32 14.285714, %v1097_v26 }
  0xf5   :  { %1392 = vst [vmem:[%s2414_s4 + $0x58] sm:$0xff] %v1328_v24 }
  0xf6   :  { %710 = vst [vmem:[%s2413_s3 + $0x48] sm:$0xff] %v646_v25  ;;  %1390 = vst [vmem:[%s2414_s4 + $0x48] sm:$0xff] %v1326_v27 }
  0xf7   :  { %v1667_v28 = vpop.f32.mrb[12].mxu0 }
  0xf8   :  { %v651_v29 = vmul.f32 14.285714, %v1667_v28  ;;  %v1735_v30 = vpop.f32.mrb[12].mxu1  ;;  %v430_v31 = vpop.f32.mrb[13].mxu0 }
  0xf9   :  { %v1331_v32 = vmul.f32 14.285714, %v1735_v30  ;;  %v649_v33 = vmul.f32 14.285714, %v430_v31  ;;  %v1110_v34 = vpop.f32.mrb[13].mxu1  ;;  %v1668_v35 = vpop.f32.mrb[14].mxu0 }
  0xfa   :  { %715 = vst [vmem:[%s2413_s3 + $0x70] sm:$0xff] %v651_v29  ;;  %v1329_v36 = vmul.f32 14.285714, %v1110_v34  ;;  %v652_v37 = vmul.f32 14.285714, %v1668_v35  ;;  %v1736_v38 = vpop.f32.mrb[14].mxu1 }
  0xfb   :  { %v433_v39 = vpop.f32.mrb[15].mxu0  ;;  %1395 = vst [vmem:[%s2414_s4 + $0x70] sm:$0xff] %v1331_v32  ;;  %713 = vst [vmem:[%s2413_s3 + $0x60] sm:$0xff] %v649_v33  ;;  %v1332_v40 = vmul.f32 14.285714, %v1736_v38  ;;  %v1113_v42 = vpop.f32.mrb[15].mxu1 }
  0xfc   :  { %v650_v41 = vmul.f32 14.285714, %v433_v39  ;;  %1393 = vst [vmem:[%s2414_s4 + $0x60] sm:$0xff] %v1329_v36  ;;  %716 = vst [vmem:[%s2413_s3 + $0x78] sm:$0xff] %v652_v37  ;;  %v1330_v43 = vmul.f32 14.285714, %v1113_v42 }
  0xfd   :  { %1396 = vst [vmem:[%s2414_s4 + $0x78] sm:$0xff] %v1332_v40 }
  0xfe   :  { %714 = vst [vmem:[%s2413_s3 + $0x68] sm:$0xff] %v650_v41  ;;  %1394 = vst [vmem:[%s2414_s4 + $0x68] sm:$0xff] %v1330_v43 }
  0xff   :  { %v1671_v44 = vpop.f32.mrb[16].mxu0 }
 0x100   :  { %v655_v45 = vmul.f32 14.285714, %v1671_v44  ;;  %v1739_v46 = vpop.f32.mrb[16].mxu1  ;;  %v446_v47 = vpop.f32.mrb[17].mxu0 }
 0x101   :  { %v1335_v48 = vmul.f32 14.285714, %v1739_v46  ;;  %v653_v49 = vmul.f32 14.285714, %v446_v47  ;;  %v1126_v50 = vpop.f32.mrb[17].mxu1  ;;  %v1672_v51 = vpop.f32.mrb[18].mxu0 }
 0x102   :  { %719 = vst [vmem:[%s2413_s3 + $0x90] sm:$0xff] %v655_v45  ;;  %v1333_v52 = vmul.f32 14.285714, %v1126_v50  ;;  %v656_v53 = vmul.f32 14.285714, %v1672_v51  ;;  %v1740_v54 = vpop.f32.mrb[18].mxu1 }
 0x103   :  { %v449_v55 = vpop.f32.mrb[19].mxu0  ;;  %1399 = vst [vmem:[%s2414_s4 + $0x90] sm:$0xff] %v1335_v48  ;;  %717 = vst [vmem:[%s2413_s3 + $0x80] sm:$0xff] %v653_v49  ;;  %v1336_v56 = vmul.f32 14.285714, %v1740_v54  ;;  %v1129_v58 = vpop.f32.mrb[19].mxu1 }
 0x104   :  { %v654_v57 = vmul.f32 14.285714, %v449_v55  ;;  %1397 = vst [vmem:[%s2414_s4 + $0x80] sm:$0xff] %v1333_v52  ;;  %720 = vst [vmem:[%s2413_s3 + $0x98] sm:$0xff] %v656_v53  ;;  %v1334_v59 = vmul.f32 14.285714, %v1129_v58 }
 0x105   :  { %1400 = vst [vmem:[%s2414_s4 + $0x98] sm:$0xff] %v1336_v56 }
 0x106   :  { %718 = vst [vmem:[%s2413_s3 + $0x88] sm:$0xff] %v654_v57  ;;  %1398 = vst [vmem:[%s2414_s4 + $0x88] sm:$0xff] %v1334_v59 }
 0x107   :  { %v1675_v60 = vpop.f32.mrb[20].mxu0 }
 0x108   :  { %v659_v61 = vmul.f32 14.285714, %v1675_v60  ;;  %v1743_v62 = vpop.f32.mrb[20].mxu1  ;;  %v462_v63 = vpop.f32.mrb[21].mxu0 }
 0x109   :  { %v1339_v0 = vmul.f32 14.285714, %v1743_v62  ;;  %v657_v1 = vmul.f32 14.285714, %v462_v63  ;;  %v1142_v2 = vpop.f32.mrb[21].mxu1  ;;  %v1676_v3 = vpop.f32.mrb[22].mxu0 }
 0x10a   :  { %723 = vst [vmem:[%s2413_s3 + $0xb0] sm:$0xff] %v659_v61  ;;  %v1337_v4 = vmul.f32 14.285714, %v1142_v2  ;;  %v660_v5 = vmul.f32 14.285714, %v1676_v3  ;;  %v1744_v6 = vpop.f32.mrb[22].mxu1 }
 0x10b   :  { %v465_v7 = vpop.f32.mrb[23].mxu0  ;;  %1403 = vst [vmem:[%s2414_s4 + $0xb0] sm:$0xff] %v1339_v0  ;;  %721 = vst [vmem:[%s2413_s3 + $0xa0] sm:$0xff] %v657_v1  ;;  %v1340_v8 = vmul.f32 14.285714, %v1744_v6  ;;  %v1145_v10 = vpop.f32.mrb[23].mxu1 }
 0x10c   :  { %v658_v9 = vmul.f32 14.285714, %v465_v7  ;;  %1401 = vst [vmem:[%s2414_s4 + $0xa0] sm:$0xff] %v1337_v4  ;;  %724 = vst [vmem:[%s2413_s3 + $0xb8] sm:$0xff] %v660_v5  ;;  %v1338_v11 = vmul.f32 14.285714, %v1145_v10 }
 0x10d   :  { %1404 = vst [vmem:[%s2414_s4 + $0xb8] sm:$0xff] %v1340_v8 }
 0x10e   :  { %722 = vst [vmem:[%s2413_s3 + $0xa8] sm:$0xff] %v658_v9  ;;  %1402 = vst [vmem:[%s2414_s4 + $0xa8] sm:$0xff] %v1338_v11 }
 0x10f   :  { %v1679_v12 = vpop.f32.mrb[24].mxu0 }
 0x110   :  { %v663_v13 = vmul.f32 14.285714, %v1679_v12  ;;  %v1747_v14 = vpop.f32.mrb[24].mxu1  ;;  %v478_v15 = vpop.f32.mrb[25].mxu0 }
 0x111   :  { %v1343_v16 = vmul.f32 14.285714, %v1747_v14  ;;  %v661_v17 = vmul.f32 14.285714, %v478_v15  ;;  %v1158_v18 = vpop.f32.mrb[25].mxu1  ;;  %v1680_v19 = vpop.f32.mrb[26].mxu0 }
 0x112   :  { %727 = vst [vmem:[%s2413_s3 + $0xd0] sm:$0xff] %v663_v13  ;;  %v1341_v20 = vmul.f32 14.285714, %v1158_v18  ;;  %v664_v21 = vmul.f32 14.285714, %v1680_v19  ;;  %v1748_v22 = vpop.f32.mrb[26].mxu1 }
 0x113   :  { %v481_v23 = vpop.f32.mrb[27].mxu0  ;;  %1407 = vst [vmem:[%s2414_s4 + $0xd0] sm:$0xff] %v1343_v16  ;;  %725 = vst [vmem:[%s2413_s3 + $0xc0] sm:$0xff] %v661_v17  ;;  %v1344_v24 = vmul.f32 14.285714, %v1748_v22  ;;  %v1161_v26 = vpop.f32.mrb[27].mxu1 }
 0x114   :  { %v662_v25 = vmul.f32 14.285714, %v481_v23  ;;  %1405 = vst [vmem:[%s2414_s4 + $0xc0] sm:$0xff] %v1341_v20  ;;  %728 = vst [vmem:[%s2413_s3 + $0xd8] sm:$0xff] %v664_v21  ;;  %v1342_v27 = vmul.f32 14.285714, %v1161_v26 }
 0x115   :  { %1408 = vst [vmem:[%s2414_s4 + $0xd8] sm:$0xff] %v1344_v24 }
 0x116   :  { %726 = vst [vmem:[%s2413_s3 + $0xc8] sm:$0xff] %v662_v25  ;;  %1406 = vst [vmem:[%s2414_s4 + $0xc8] sm:$0xff] %v1342_v27 }
 0x117   :  { %v1683_v28 = vpop.f32.mrb[28].mxu0 }
 0x118   :  { %v667_v29 = vmul.f32 14.285714, %v1683_v28  ;;  %v1751_v30 = vpop.f32.mrb[28].mxu1  ;;  %v494_v31 = vpop.f32.mrb[29].mxu0 }
 0x119   :  { %v1347_v32 = vmul.f32 14.285714, %v1751_v30  ;;  %v665_v33 = vmul.f32 14.285714, %v494_v31  ;;  %v1174_v34 = vpop.f32.mrb[29].mxu1  ;;  %v1684_v35 = vpop.f32.mrb[30].mxu0 }
 0x11a   :  { %731 = vst [vmem:[%s2413_s3 + $0xf0] sm:$0xff] %v667_v29  ;;  %v1345_v36 = vmul.f32 14.285714, %v1174_v34  ;;  %v668_v37 = vmul.f32 14.285714, %v1684_v35  ;;  %v1752_v38 = vpop.f32.mrb[30].mxu1 }
 0x11b   :  { %v497_v39 = vpop.f32.mrb[31].mxu0  ;;  %1411 = vst [vmem:[%s2414_s4 + $0xf0] sm:$0xff] %v1347_v32  ;;  %729 = vst [vmem:[%s2413_s3 + $0xe0] sm:$0xff] %v665_v33  ;;  %v1348_v40 = vmul.f32 14.285714, %v1752_v38  ;;  %v1177_v42 = vpop.f32.mrb[31].mxu1 }
 0x11c   :  { %v666_v41 = vmul.f32 14.285714, %v497_v39  ;;  %1409 = vst [vmem:[%s2414_s4 + $0xe0] sm:$0xff] %v1345_v36  ;;  %732 = vst [vmem:[%s2413_s3 + $0xf8] sm:$0xff] %v668_v37  ;;  %v1346_v43 = vmul.f32 14.285714, %v1177_v42 }
 0x11d   :  { %1412 = vst [vmem:[%s2414_s4 + $0xf8] sm:$0xff] %v1348_v40 }
 0x11e   :  { %730 = vst [vmem:[%s2413_s3 + $0xe8] sm:$0xff] %v666_v41  ;;  %1410 = vst [vmem:[%s2414_s4 + $0xe8] sm:$0xff] %v1346_v43 }
 0x11f   :  { %v1687_v44 = vpop.f32.mrb[32].mxu0 }
 0x120   :  { %v671_v45 = vmul.f32 14.285714, %v1687_v44  ;;  %v1755_v46 = vpop.f32.mrb[32].mxu1  ;;  %v510_v47 = vpop.f32.mrb[33].mxu0 }
 0x121   :  { %v1351_v48 = vmul.f32 14.285714, %v1755_v46  ;;  %v669_v49 = vmul.f32 14.285714, %v510_v47  ;;  %v1190_v50 = vpop.f32.mrb[33].mxu1  ;;  %v1688_v51 = vpop.f32.mrb[34].mxu0 }
 0x122   :  { %735 = vst [vmem:[%s2413_s3 + $0x110] sm:$0xff] %v671_v45  ;;  %v1349_v52 = vmul.f32 14.285714, %v1190_v50  ;;  %v672_v53 = vmul.f32 14.285714, %v1688_v51  ;;  %v1756_v54 = vpop.f32.mrb[34].mxu1 }
 0x123   :  { %v513_v55 = vpop.f32.mrb[35].mxu0  ;;  %1415 = vst [vmem:[%s2414_s4 + $0x110] sm:$0xff] %v1351_v48  ;;  %733 = vst [vmem:[%s2413_s3 + $0x100] sm:$0xff] %v669_v49  ;;  %v1352_v56 = vmul.f32 14.285714, %v1756_v54  ;;  %v1193_v58 = vpop.f32.mrb[35].mxu1 }
 0x124   :  { %v670_v57 = vmul.f32 14.285714, %v513_v55  ;;  %1413 = vst [vmem:[%s2414_s4 + $0x100] sm:$0xff] %v1349_v52  ;;  %736 = vst [vmem:[%s2413_s3 + $0x118] sm:$0xff] %v672_v53  ;;  %v1350_v59 = vmul.f32 14.285714, %v1193_v58 }
 0x125   :  { %1416 = vst [vmem:[%s2414_s4 + $0x118] sm:$0xff] %v1352_v56 }
 0x126   :  { %734 = vst [vmem:[%s2413_s3 + $0x108] sm:$0xff] %v670_v57  ;;  %1414 = vst [vmem:[%s2414_s4 + $0x108] sm:$0xff] %v1350_v59 }
 0x127   :  { %v1691_v60 = vpop.f32.mrb[36].mxu0 }
 0x128   :  { %v675_v61 = vmul.f32 14.285714, %v1691_v60  ;;  %v1759_v62 = vpop.f32.mrb[36].mxu1  ;;  %v526_v63 = vpop.f32.mrb[37].mxu0 }
 0x129   :  { %v1355_v0 = vmul.f32 14.285714, %v1759_v62  ;;  %v673_v1 = vmul.f32 14.285714, %v526_v63  ;;  %v1206_v2 = vpop.f32.mrb[37].mxu1  ;;  %v1692_v3 = vpop.f32.mrb[38].mxu0 }
 0x12a   :  { %739 = vst [vmem:[%s2413_s3 + $0x130] sm:$0xff] %v675_v61  ;;  %v1353_v4 = vmul.f32 14.285714, %v1206_v2  ;;  %v676_v5 = vmul.f32 14.285714, %v1692_v3  ;;  %v1760_v6 = vpop.f32.mrb[38].mxu1 }
 0x12b   :  { %v529_v7 = vpop.f32.mrb[39].mxu0  ;;  %1419 = vst [vmem:[%s2414_s4 + $0x130] sm:$0xff] %v1355_v0  ;;  %737 = vst [vmem:[%s2413_s3 + $0x120] sm:$0xff] %v673_v1  ;;  %v1356_v8 = vmul.f32 14.285714, %v1760_v6  ;;  %v1209_v10 = vpop.f32.mrb[39].mxu1 }
 0x12c   :  { %v674_v9 = vmul.f32 14.285714, %v529_v7  ;;  %1417 = vst [vmem:[%s2414_s4 + $0x120] sm:$0xff] %v1353_v4  ;;  %740 = vst [vmem:[%s2413_s3 + $0x138] sm:$0xff] %v676_v5  ;;  %v1354_v11 = vmul.f32 14.285714, %v1209_v10 }
 0x12d   :  { %1420 = vst [vmem:[%s2414_s4 + $0x138] sm:$0xff] %v1356_v8 }
 0x12e   :  { %738 = vst [vmem:[%s2413_s3 + $0x128] sm:$0xff] %v674_v9  ;;  %1418 = vst [vmem:[%s2414_s4 + $0x128] sm:$0xff] %v1354_v11 }
 0x12f   :  { %v1695_v12 = vpop.f32.mrb[40].mxu0 }
 0x130   :  { %v679_v13 = vmul.f32 14.285714, %v1695_v12  ;;  %v1763_v14 = vpop.f32.mrb[40].mxu1  ;;  %v542_v15 = vpop.f32.mrb[41].mxu0 }
 0x131   :  { %v1359_v16 = vmul.f32 14.285714, %v1763_v14  ;;  %v677_v17 = vmul.f32 14.285714, %v542_v15  ;;  %v1222_v18 = vpop.f32.mrb[41].mxu1  ;;  %v1696_v19 = vpop.f32.mrb[42].mxu0 }
 0x132   :  { %743 = vst [vmem:[%s2413_s3 + $0x150] sm:$0xff] %v679_v13  ;;  %v1357_v20 = vmul.f32 14.285714, %v1222_v18  ;;  %v680_v21 = vmul.f32 14.285714, %v1696_v19  ;;  %v1764_v22 = vpop.f32.mrb[42].mxu1 }
 0x133   :  { %v545_v23 = vpop.f32.mrb[43].mxu0  ;;  %1423 = vst [vmem:[%s2414_s4 + $0x150] sm:$0xff] %v1359_v16  ;;  %741 = vst [vmem:[%s2413_s3 + $0x140] sm:$0xff] %v677_v17  ;;  %v1360_v24 = vmul.f32 14.285714, %v1764_v22  ;;  %v1225_v26 = vpop.f32.mrb[43].mxu1 }
 0x134   :  { %v678_v25 = vmul.f32 14.285714, %v545_v23  ;;  %1421 = vst [vmem:[%s2414_s4 + $0x140] sm:$0xff] %v1357_v20  ;;  %744 = vst [vmem:[%s2413_s3 + $0x158] sm:$0xff] %v680_v21  ;;  %v1358_v27 = vmul.f32 14.285714, %v1225_v26 }
 0x135   :  { %1424 = vst [vmem:[%s2414_s4 + $0x158] sm:$0xff] %v1360_v24 }
 0x136   :  { %742 = vst [vmem:[%s2413_s3 + $0x148] sm:$0xff] %v678_v25  ;;  %1422 = vst [vmem:[%s2414_s4 + $0x148] sm:$0xff] %v1358_v27 }
 0x137   :  { %v1699_v28 = vpop.f32.mrb[44].mxu0 }
 0x138   :  { %v683_v29 = vmul.f32 14.285714, %v1699_v28  ;;  %v1767_v30 = vpop.f32.mrb[44].mxu1  ;;  %v558_v31 = vpop.f32.mrb[45].mxu0 }
 0x139   :  { %v1363_v32 = vmul.f32 14.285714, %v1767_v30  ;;  %v681_v33 = vmul.f32 14.285714, %v558_v31  ;;  %v1238_v34 = vpop.f32.mrb[45].mxu1  ;;  %v1700_v35 = vpop.f32.mrb[46].mxu0 }
 0x13a   :  { %747 = vst [vmem:[%s2413_s3 + $0x170] sm:$0xff] %v683_v29  ;;  %v1361_v36 = vmul.f32 14.285714, %v1238_v34  ;;  %v684_v37 = vmul.f32 14.285714, %v1700_v35  ;;  %v1768_v38 = vpop.f32.mrb[46].mxu1 }
 0x13b   :  { %v561_v39 = vpop.f32.mrb[47].mxu0  ;;  %1427 = vst [vmem:[%s2414_s4 + $0x170] sm:$0xff] %v1363_v32  ;;  %745 = vst [vmem:[%s2413_s3 + $0x160] sm:$0xff] %v681_v33  ;;  %v1364_v40 = vmul.f32 14.285714, %v1768_v38  ;;  %v1241_v42 = vpop.f32.mrb[47].mxu1 }
 0x13c   :  { %v682_v41 = vmul.f32 14.285714, %v561_v39  ;;  %1425 = vst [vmem:[%s2414_s4 + $0x160] sm:$0xff] %v1361_v36  ;;  %748 = vst [vmem:[%s2413_s3 + $0x178] sm:$0xff] %v684_v37  ;;  %v1362_v43 = vmul.f32 14.285714, %v1241_v42 }
 0x13d   :  { %1428 = vst [vmem:[%s2414_s4 + $0x178] sm:$0xff] %v1364_v40 }
 0x13e   :  { %746 = vst [vmem:[%s2413_s3 + $0x168] sm:$0xff] %v682_v41  ;;  %1426 = vst [vmem:[%s2414_s4 + $0x168] sm:$0xff] %v1362_v43 }
 0x13f   :  { %v1703_v44 = vpop.f32.mrb[48].mxu0 }
 0x140   :  { %v687_v45 = vmul.f32 14.285714, %v1703_v44  ;;  %v1771_v46 = vpop.f32.mrb[48].mxu1  ;;  %v574_v47 = vpop.f32.mrb[49].mxu0 }
 0x141   :  { %v1367_v48 = vmul.f32 14.285714, %v1771_v46  ;;  %v685_v49 = vmul.f32 14.285714, %v574_v47  ;;  %v1254_v50 = vpop.f32.mrb[49].mxu1  ;;  %v1704_v51 = vpop.f32.mrb[50].mxu0 }
 0x142   :  { %751 = vst [vmem:[%s2413_s3 + $0x190] sm:$0xff] %v687_v45  ;;  %v1365_v52 = vmul.f32 14.285714, %v1254_v50  ;;  %v688_v53 = vmul.f32 14.285714, %v1704_v51  ;;  %v1772_v54 = vpop.f32.mrb[50].mxu1 }
 0x143   :  { %v577_v55 = vpop.f32.mrb[51].mxu0  ;;  %1431 = vst [vmem:[%s2414_s4 + $0x190] sm:$0xff] %v1367_v48  ;;  %749 = vst [vmem:[%s2413_s3 + $0x180] sm:$0xff] %v685_v49  ;;  %v1368_v56 = vmul.f32 14.285714, %v1772_v54  ;;  %v1257_v58 = vpop.f32.mrb[51].mxu1 }
 0x144   :  { %v686_v57 = vmul.f32 14.285714, %v577_v55  ;;  %1429 = vst [vmem:[%s2414_s4 + $0x180] sm:$0xff] %v1365_v52  ;;  %752 = vst [vmem:[%s2413_s3 + $0x198] sm:$0xff] %v688_v53  ;;  %v1366_v59 = vmul.f32 14.285714, %v1257_v58 }
 0x145   :  { %1432 = vst [vmem:[%s2414_s4 + $0x198] sm:$0xff] %v1368_v56 }
 0x146   :  { %750 = vst [vmem:[%s2413_s3 + $0x188] sm:$0xff] %v686_v57  ;;  %1430 = vst [vmem:[%s2414_s4 + $0x188] sm:$0xff] %v1366_v59 }
 0x147   :  { %v1707_v60 = vpop.f32.mrb[52].mxu0 }
 0x148   :  { %v691_v61 = vmul.f32 14.285714, %v1707_v60  ;;  %v1775_v62 = vpop.f32.mrb[52].mxu1  ;;  %v590_v63 = vpop.f32.mrb[53].mxu0 }
 0x149   :  { %v1371_v0 = vmul.f32 14.285714, %v1775_v62  ;;  %v689_v1 = vmul.f32 14.285714, %v590_v63  ;;  %v1270_v2 = vpop.f32.mrb[53].mxu1  ;;  %v1708_v3 = vpop.f32.mrb[54].mxu0 }
 0x14a   :  { %755 = vst [vmem:[%s2413_s3 + $0x1b0] sm:$0xff] %v691_v61  ;;  %v1369_v4 = vmul.f32 14.285714, %v1270_v2  ;;  %v692_v5 = vmul.f32 14.285714, %v1708_v3  ;;  %v1776_v6 = vpop.f32.mrb[54].mxu1 }
 0x14b   :  { %v593_v7 = vpop.f32.mrb[55].mxu0  ;;  %1435 = vst [vmem:[%s2414_s4 + $0x1b0] sm:$0xff] %v1371_v0  ;;  %753 = vst [vmem:[%s2413_s3 + $0x1a0] sm:$0xff] %v689_v1  ;;  %v1372_v8 = vmul.f32 14.285714, %v1776_v6  ;;  %v1273_v10 = vpop.f32.mrb[55].mxu1 }
 0x14c   :  { %v690_v9 = vmul.f32 14.285714, %v593_v7  ;;  %1433 = vst [vmem:[%s2414_s4 + $0x1a0] sm:$0xff] %v1369_v4  ;;  %756 = vst [vmem:[%s2413_s3 + $0x1b8] sm:$0xff] %v692_v5  ;;  %v1370_v11 = vmul.f32 14.285714, %v1273_v10 }
 0x14d   :  { %1436 = vst [vmem:[%s2414_s4 + $0x1b8] sm:$0xff] %v1372_v8 }
 0x14e   :  { %754 = vst [vmem:[%s2413_s3 + $0x1a8] sm:$0xff] %v690_v9  ;;  %1434 = vst [vmem:[%s2414_s4 + $0x1a8] sm:$0xff] %v1370_v11 }
 0x14f   :  { %v1711_v12 = vpop.f32.mrb[56].mxu0 }
 0x150   :  { %v695_v13 = vmul.f32 14.285714, %v1711_v12  ;;  %v1779_v14 = vpop.f32.mrb[56].mxu1  ;;  %v606_v15 = vpop.f32.mrb[57].mxu0 }
 0x151   :  { %v1375_v16 = vmul.f32 14.285714, %v1779_v14  ;;  %v693_v17 = vmul.f32 14.285714, %v606_v15  ;;  %v1286_v18 = vpop.f32.mrb[57].mxu1  ;;  %v1712_v19 = vpop.f32.mrb[58].mxu0 }
 0x152   :  { %759 = vst [vmem:[%s2413_s3 + $0x1d0] sm:$0xff] %v695_v13  ;;  %v1373_v20 = vmul.f32 14.285714, %v1286_v18  ;;  %v696_v21 = vmul.f32 14.285714, %v1712_v19  ;;  %v1780_v22 = vpop.f32.mrb[58].mxu1 }
 0x153   :  { %v609_v23 = vpop.f32.mrb[59].mxu0  ;;  %1439 = vst [vmem:[%s2414_s4 + $0x1d0] sm:$0xff] %v1375_v16  ;;  %757 = vst [vmem:[%s2413_s3 + $0x1c0] sm:$0xff] %v693_v17  ;;  %v1376_v24 = vmul.f32 14.285714, %v1780_v22  ;;  %v1289_v26 = vpop.f32.mrb[59].mxu1 }
 0x154   :  { %v694_v25 = vmul.f32 14.285714, %v609_v23  ;;  %1437 = vst [vmem:[%s2414_s4 + $0x1c0] sm:$0xff] %v1373_v20  ;;  %760 = vst [vmem:[%s2413_s3 + $0x1d8] sm:$0xff] %v696_v21  ;;  %v1374_v27 = vmul.f32 14.285714, %v1289_v26 }
 0x155   :  { %1440 = vst [vmem:[%s2414_s4 + $0x1d8] sm:$0xff] %v1376_v24 }
 0x156   :  { %758 = vst [vmem:[%s2413_s3 + $0x1c8] sm:$0xff] %v694_v25  ;;  %1438 = vst [vmem:[%s2414_s4 + $0x1c8] sm:$0xff] %v1374_v27 }
 0x157   :  { %v1715_v28 = vpop.f32.mrb[60].mxu0 }
 0x158   :  { %v699_v29 = vmul.f32 14.285714, %v1715_v28  ;;  %v1783_v30 = vpop.f32.mrb[60].mxu1  ;;  %v622_v31 = vpop.f32.mrb[61].mxu0 }
 0x159   :  { %v1379_v32 = vmul.f32 14.285714, %v1783_v30  ;;  %v697_v33 = vmul.f32 14.285714, %v622_v31  ;;  %v1302_v34 = vpop.f32.mrb[61].mxu1  ;;  %v1716_v35 = vpop.f32.mrb[62].mxu0 }
 0x15a   :  { %763 = vst [vmem:[%s2413_s3 + $0x1f0] sm:$0xff] %v699_v29  ;;  %v1377_v36 = vmul.f32 14.285714, %v1302_v34  ;;  %v700_v37 = vmul.f32 14.285714, %v1716_v35  ;;  %v1784_v38 = vpop.f32.mrb[62].mxu1 }
 0x15b   :  { %v625_v39 = vpop.f32.mrb[63].mxu0  ;;  %1443 = vst [vmem:[%s2414_s4 + $0x1f0] sm:$0xff] %v1379_v32  ;;  %761 = vst [vmem:[%s2413_s3 + $0x1e0] sm:$0xff] %v697_v33  ;;  %v1380_v40 = vmul.f32 14.285714, %v1784_v38  ;;  %v1305_v42 = vpop.f32.mrb[63].mxu1 }
 0x15c   :  { %v698_v41 = vmul.f32 14.285714, %v625_v39  ;;  %1441 = vst [vmem:[%s2414_s4 + $0x1e0] sm:$0xff] %v1377_v36  ;;  %764 = vst [vmem:[%s2413_s3 + $0x1f8] sm:$0xff] %v700_v37  ;;  %v1378_v43 = vmul.f32 14.285714, %v1305_v42 }
 0x15d   :  { %1444 = vst [vmem:[%s2414_s4 + $0x1f8] sm:$0xff] %v1380_v40 }
 0x15e   :  { %762 = vst [vmem:[%s2413_s3 + $0x1e8] sm:$0xff] %v698_v41  ;;  %1442 = vst [vmem:[%s2414_s4 + $0x1e8] sm:$0xff] %v1378_v43 }

</bundles_post_ra>
